<compile_context>
chip_gen: v7x
topology: tpu7x:2x2x1
jax: 0.10.0
libtpu: 0.0.40
codegen_flags: <defaults>
</compile_context>

<pallas_src>
import numpy as np
import jax
import jax.numpy as jnp
from jax import lax
from jax.experimental import pallas as pl
from jax.experimental.pallas import tpu as pltpu

BN_EPS = 1e-5
_K, _STRIDE, _PAD = 3, 2, 1


def _conv_out(side):
    return (side + 2 * _PAD - _K) // _STRIDE + 1


# ---------------------------------------------------------------------------
# Fused kernel:
#   conv1 (im2col GEMM) -> BN -> ReLU
#   -> [tap-conv -> BN -> ReLU] * (len(channels)-1)
#   -> tap-conv + bias -> ReLU
#   -> merged fc_mu|fc_logvar (flatten folded into the weight) -> reparameterize
# Every intermediate stays in VMEM / vregs; no HBM round trips between layers.
# ---------------------------------------------------------------------------
def _make_kernel(num_mid_bn_layers, latent):
    f32 = jnp.float32

    def bn_relu(y, gb_ref):
        # y: (M, C) with rows = (n, oy, ox).  BatchNorm2d training-mode batch
        # statistics are plain per-column reductions in this layout.
        inv_m = 1.0 / y.shape[0]
        mean = jnp.sum(y, axis=0, keepdims=True) * inv_m
        cen = y - mean
        # mean-centered (two-pass) biased variance: avoids E[x^2]-E[x]^2 cancellation
        var = jnp.sum(cen * cen, axis=0, keepdims=True) * inv_m
        scale = gb_ref[0:1, :] * lax.rsqrt(var + BN_EPS)   # gamma * rsqrt(var+eps)
        return jnp.maximum(cen * scale + gb_ref[1:2, :], 0.0)

    def conv_taps(a, wstack_ref, s_ref):
        # a: (M_in, Cin).  wstack: (Cin, 9*Cout) f32.  s: (9, M_out, M_in) 0/1 bf16.
        # y = sum_t S_t @ (a @ W_t)  ==  3x3 / stride-2 / pad-1 conv, NHWC-row layout.
        co = wstack_ref.shape[1] // 9
        b = jnp.dot(a, wstack_ref[...], preferred_element_type=f32)   # (M_in, 9*Cout)
        y = jnp.zeros((s_ref.shape[1], co), f32)
        for t in range(9):
            y = y + jnp.dot(s_ref[t].astype(f32),
                            b[:, t * co:(t + 1) * co],
                            preferred_element_type=f32)
        return y

    def kernel(*refs):
        i = 0
        patches_ref, w1_ref, gb1_ref = refs[i:i + 3]; i += 3

        # conv1: wrapper-side im2col -> one big-M GEMM (M = N*Ho1*Wo1), then BN+ReLU.
        a = jnp.dot(patches_ref[...], w1_ref[...], preferred_element_type=f32)
        a = bn_relu(a, gb1_ref)

        for _ in range(num_mid_bn_layers):
            wstack_ref, s_ref, gb_ref = refs[i:i + 3]; i += 3
            a = bn_relu(conv_taps(a, wstack_ref, s_ref), gb_ref)

        # last conv: tap-conv + bias -> ReLU (no BN).
        wstack_ref, s_ref, bias_ref = refs[i:i + 3]; i += 3
        a = jnp.maximum(conv_taps(a, wstack_ref, s_ref) + bias_ref[...], 0.0)

        rcat_ref, bh_ref, pb_ref, eps_ref = refs[i:i + 4]; i += 4
        z_ref, heads_ref = refs[i:i + 2]

        # merged fc_mu|fc_logvar head; the NCHW flatten permutation is folded into
        # rcat / pb at init, so no in-kernel transpose or reshape is needed.
        two_l = 2 * latent
        bh = jnp.dot(a, rcat_ref[...], preferred_element_type=f32)    # (M3, S3*2L)
        heads = jnp.zeros((pb_ref.shape[1], two_l), f32)
        for s in range(pb_ref.shape[0]):
            heads = heads + jnp.dot(pb_ref[s].astype(f32),
                                    bh[:, s * two_l:(s + 1) * two_l],
                                    preferred_element_type=f32)
        heads = heads + bh_ref[...]
        heads_ref[...] = heads                                        # [mu | logvar]

        mu = heads[:, :latent]
        logvar = heads[:, latent:]
        z_ref[...] = mu + jnp.exp(0.5 * logvar) * eps_ref[...]

    return kernel


# ---------------------------------------------------------------------------
# Wrapper-side helpers (trace-time constants / cheap XLA preprocessing)
# ---------------------------------------------------------------------------
def _im2col(x):
    """3x3 / stride-2 / pad-1 patches of an NCHW input.
    Rows ordered (n, oy, ox); columns ordered (ci, kh, kw)."""
    n, c, h, w = x.shape
    ho, wo = _conv_out(h), _conv_out(w)
    xp = jnp.pad(x, ((0, 0), (0, 0), (_PAD, _PAD), (_PAD, _PAD)))
    taps = []
    for kh in range(_K):
        for kw in range(_K):
            taps.append(lax.slice(
                xp, (0, 0, kh, kw),
                (n, c, kh + _STRIDE * (ho - 1) + 1, kw + _STRIDE * (wo - 1) + 1),
                (1, 1, _STRIDE, _STRIDE)))                       # (n, c, ho, wo)
    p = jnp.stack(taps, axis=-1)                                 # (n, c, ho, wo, 9)
    p = jnp.transpose(p, (0, 2, 3, 1, 4))                        # (n, ho, wo, c, 9)
    return p.reshape(n * ho * wo, c * _K * _K)


def _tap_selectors(n, hi, wi, ho, wo):
    """0/1 selectors S[t, m_out, m_in] for a 3x3/stride-2/pad-1 conv in
    (rows = n*oy*ox) layout.  Block-diagonal over the batch (O(N^2) rows*cols —
    fine at these sizes; a per-sample 'parallel' grid axis would replace this at
    large N and also feed v7x's second TensorCore)."""
    s = np.zeros((_K * _K, n * ho * wo, n * hi * wi), np.float32)
    for kh in range(_K):
        for kw in range(_K):
            t = kh * _K + kw
            for oy in range(ho):
                iy = _STRIDE * oy + kh - _PAD
                if not 0 <= iy < hi:
                    continue
                for ox in range(wo):
                    ix = _STRIDE * ox + kw - _PAD
                    if not 0 <= ix < wi:
                        continue
                    for b in range(n):
                        s[t, b * ho * wo + oy * wo + ox,
                          b * hi * wi + iy * wi + ix] = 1.0
    return jnp.asarray(s, jnp.bfloat16)   # exact 0/1 -> bf16 halves the DMA bytes


def _batch_selectors(n, s_sp):
    """0/1 selectors P[s, n, m] picking row n*S+s — folds the flatten's spatial
    index back onto the batch rows of the head GEMM."""
    p = np.zeros((s_sp, n, n * s_sp), np.float32)
    for s in range(s_sp):
        for b in range(n):
            p[s, b, b * s_sp + s] = 1.0
    return jnp.asarray(p, jnp.bfloat16)


# ---------------------------------------------------------------------------
# Builder: returns (init_fn, forward_fn, reference_fn)
# ---------------------------------------------------------------------------
def build_var_encoder(channels, latent_dims, input_size):
    in_ch, height, width = input_size
    pairs = list(zip([in_ch] + channels, channels)) + [(channels[-2], channels[-1])]
    n_conv = len(pairs)

    geom = []
    hi, wi = height, width
    for idx, (ci, co) in enumerate(pairs):
        ho, wo = _conv_out(hi), _conv_out(wi)
        geom.append(dict(ci=ci, co=co, hi=hi, wi=wi, ho=ho, wo=wo,
                         last=(idx == n_conv - 1)))
        hi, wi = ho, wo
    c_last, s_last = pairs[-1][1], hi * wi
    conv_out_sz = c_last * s_last

    def init(key):
        keys = iter(jax.random.split(key, 2 * n_conv + 4))
        layers = []
        for idx, g in enumerate(geom):
            kw_, kb_ = next(keys), next(keys)
            w = 0.1 * jax.random.normal(kw_, (g["co"], g["ci"], 3, 3), jnp.float32)
            b = 0.1 * jax.random.normal(kb_, (g["co"],), jnp.float32)
            wt = jnp.transpose(w, (1, 2, 3, 0))              # (ci, kh, kw, co)
            layer = {"w_raw": w, "b_raw": b}                 # raw copies: reference only
            if idx == 0:
                layer["w1mat"] = wt.reshape(g["ci"] * 9, g["co"])       # (Cin*9, C1)
            else:
                layer["wstack"] = wt.reshape(g["ci"], 9 * g["co"])      # (Cin, 9*Cout)
            if g["last"]:
                layer["bias"] = b.reshape(1, g["co"])
            else:
                # Conv bias omitted in the kernel: exactly cancelled by the
                # training-mode BN mean subtraction that follows.
                layer["gb"] = jnp.concatenate(
                    [jnp.ones((1, g["co"]), jnp.float32),     # gamma (BatchNorm2d default)
                     jnp.zeros((1, g["co"]), jnp.float32)])   # beta
            layers.append(layer)

        kmw, kmb, klw, klb = next(keys), next(keys), next(keys), next(keys)
        w_mu = 0.1 * jax.random.normal(kmw, (conv_out_sz, latent_dims), jnp.float32)
        b_mu = 0.1 * jax.random.normal(kmb, (latent_dims,), jnp.float32)
        w_lv = 0.1 * jax.random.normal(klw, (conv_out_sz, latent_dims), jnp.float32)
        b_lv = 0.1 * jax.random.normal(klb, (latent_dims,), jnp.float32)
        w_head = jnp.concatenate([w_mu, w_lv], axis=1)        # (C*S, 2L), NCHW-flat rows
        return {
            "layers": layers,
            # flatten folded into the head weight: rcat[c, s*2L+l] = w_head[c*S+s, l]
            "rcat": w_head.reshape(c_last, s_last * 2 * latent_dims),
            "b_head": jnp.concatenate([b_mu, b_lv]).reshape(1, 2 * latent_dims),
            "w_mu": w_mu, "b_mu": b_mu, "w_lv": w_lv, "b_lv": b_lv,   # reference only
        }

    def forward(params, x, eps):
        n = x.shape[0]
        layers = params["layers"]
        inputs = [_im2col(x), layers[0]["w1mat"], layers[0]["gb"]]
        for g, lyr in zip(geom[1:], layers[1:]):
            s_all = _tap_selectors(n, g["hi"], g["wi"], g["ho"], g["wo"])
            inputs += [lyr["wstack"], s_all,
                       lyr["bias"] if g["last"] else lyr["gb"]]
        inputs += [params["rcat"], params["b_head"],
                   _batch_selectors(n, s_last), eps]

        out_shape = (jax.ShapeDtypeStruct((n, latent_dims), jnp.float32),
                     jax.ShapeDtypeStruct((n, 2 * latent_dims), jnp.float32))
        vmem = pl.BlockSpec(memory_space=pltpu.MemorySpace.VMEM)
        # Gridless call: total operands are a few hundred KB, everything sits in
        # VMEM for the single invocation; nothing left that is worth pipelining.
        z, heads = pl.pallas_call(
            _make_kernel(num_mid_bn_layers=len(channels) - 1, latent=latent_dims),
            out_shape=out_shape,
            in_specs=[pl.BlockSpec(memory_space=pltpu.MemorySpace.VMEM)
                      for _ in inputs],
            out_specs=(vmem, vmem),
        )(*inputs)
        mu, logvar = heads[:, :latent_dims], heads[:, latent_dims:]
        return z, (mu, logvar)

    def reference(params, x, eps):
        """Pure jax.numpy reference of VarEncoder.forward (training-mode BN)."""
        a = x
        for g, lyr in zip(geom, params["layers"]):
            y = lax.conv_general_dilated(
                a, lyr["w_raw"], window_strides=(2, 2), padding=((1, 1), (1, 1)),
                dimension_numbers=("NCHW", "OIHW", "NCHW"))
            y = y + lyr["b_raw"].reshape(1, -1, 1, 1)
            if not g["last"]:
                mean = jnp.mean(y, axis=(0, 2, 3), keepdims=True)
                var = jnp.var(y, axis=(0, 2, 3), keepdims=True)   # biased
                y = (y - mean) / jnp.sqrt(var + BN_EPS)           # gamma=1, beta=0
            a = jnp.maximum(y, 0.0)
        flat = a.reshape(a.shape[0], -1)                          # NCHW flatten
        mu = flat @ params["w_mu"] + params["b_mu"]
        lv = flat @ params["w_lv"] + params["b_lv"]
        return mu + jnp.exp(0.5 * lv) * eps, (mu, lv)

    return init, forward, reference


# ---------------------------------------------------------------------------
if __name__ == "__main__":
    # channels[-1] must equal channels[-2] for the reference module to be
    # shape-consistent (its extra final conv takes channels[-2] as input).
    channels = [4, 4]
    latent_dims = 8
    N, C, H, W = 2, 4, 16, 16

    key = jax.random.PRNGKey(0)
    kx, kp, ke = jax.random.split(key, 3)

    init, forward, reference = build_var_encoder(channels, latent_dims, (C, H, W))
    params = init(kp)
    x = jax.random.normal(kx, (N, C, H, W), jnp.float32)
    eps = jax.random.normal(ke, (N, latent_dims), jnp.float32)

    z, (mu, logvar) = jax.jit(forward)(params, x, eps)
    jax.block_until_ready((z, mu, logvar))
    assert z.shape == (N, latent_dims)
    assert mu.shape == (N, latent_dims) and logvar.shape == (N, latent_dims)

    # Correctness check against a pure-JAX implementation of the module.
    z_ref, (mu_ref, lv_ref) = reference(params, x, eps)
    np.testing.assert_allclose(np.asarray(mu), np.asarray(mu_ref), rtol=1e-3, atol=1e-4)
    np.testing.assert_allclose(np.asarray(logvar), np.asarray(lv_ref), rtol=1e-3, atol=1e-4)
    np.testing.assert_allclose(np.asarray(z), np.asarray(z_ref), rtol=1e-3, atol=1e-4)

    print("KERNEL_OK")
</pallas_src>

<mosaic_0001>
module attributes {stable_mosaic.version = 11 : i64} {
  func.func @kernel(%arg0: memref<128x36xf32, #tpu.memory_space<vmem>>, %arg1: memref<36x4xf32, #tpu.memory_space<vmem>>, %arg2: memref<2x4xf32, #tpu.memory_space<vmem>>, %arg3: memref<4x36xf32, #tpu.memory_space<vmem>>, %arg4: memref<9x32x128xbf16, #tpu.memory_space<vmem>>, %arg5: memref<2x4xf32, #tpu.memory_space<vmem>>, %arg6: memref<4x36xf32, #tpu.memory_space<vmem>>, %arg7: memref<9x8x32xbf16, #tpu.memory_space<vmem>>, %arg8: memref<1x4xf32, #tpu.memory_space<vmem>>, %arg9: memref<4x64xf32, #tpu.memory_space<vmem>>, %arg10: memref<1x16xf32, #tpu.memory_space<vmem>>, %arg11: memref<4x2x8xbf16, #tpu.memory_space<vmem>>, %arg12: memref<2x8xf32, #tpu.memory_space<vmem>>, %arg13: memref<2x8xf32, #tpu.memory_space<vmem>>, %arg14: memref<2x16xf32, #tpu.memory_space<vmem>>) attributes {dimension_semantics = [], scalar_prefetch = 0 : i64, scratch_operands = 0 : i64, tpu.core_type = #tpu.core_type<tc>} {
    %c0 = arith.constant 0 : index
    %c0_0 = arith.constant 0 : index
    %0 = vector.load %arg0[%c0, %c0_0] : memref<128x36xf32, #tpu.memory_space<vmem>>, vector<128x36xf32>
    %c0_1 = arith.constant 0 : index
    %c0_2 = arith.constant 0 : index
    %1 = vector.load %arg1[%c0_1, %c0_2] : memref<36x4xf32, #tpu.memory_space<vmem>>, vector<36x4xf32>
    %cst = arith.constant dense<0.000000e+00> : vector<128x4xf32>
    %2 = tpu.matmul %0, %1, %cst {dimension_numbers = #tpu.dot_dimension_numbers<[1], [0], [0], [1], [0, 0, 1, 1], [], []>} : vector<128x36xf32>, vector<36x4xf32>, vector<128x4xf32> -> vector<128x4xf32>
    %cst_3 = arith.constant dense<0.000000e+00> : vector<4xf32>
    %3 = vector.multi_reduction <add>, %2, %cst_3 [0] : vector<128x4xf32> to vector<4xf32>
    %4 = vector.shape_cast %3 : vector<4xf32> to vector<1x4xf32>
    %cst_4 = arith.constant 7.812500e-03 : f32
    %5 = vector.broadcast %cst_4 : f32 to vector<1x4xf32>
    %6 = arith.mulf %4, %5 : vector<1x4xf32>
    %7 = vector.broadcast %6 : vector<1x4xf32> to vector<128x4xf32>
    %8 = arith.subf %2, %7 : vector<128x4xf32>
    %9 = arith.mulf %8, %8 : vector<128x4xf32>
    %cst_5 = arith.constant dense<0.000000e+00> : vector<4xf32>
    %10 = vector.multi_reduction <add>, %9, %cst_5 [0] : vector<128x4xf32> to vector<4xf32>
    %11 = vector.shape_cast %10 : vector<4xf32> to vector<1x4xf32>
    %cst_6 = arith.constant 7.812500e-03 : f32
    %12 = vector.broadcast %cst_6 : f32 to vector<1x4xf32>
    %13 = arith.mulf %11, %12 : vector<1x4xf32>
    %c0_7 = arith.constant 0 : index
    %c0_8 = arith.constant 0 : index
    %14 = vector.load %arg2[%c0_7, %c0_8] : memref<2x4xf32, #tpu.memory_space<vmem>>, vector<1x4xf32>
    %cst_9 = arith.constant 9.99999974E-6 : f32
    %15 = vector.broadcast %cst_9 : f32 to vector<1x4xf32>
    %16 = arith.addf %13, %15 : vector<1x4xf32>
    %17 = math.rsqrt %16 : vector<1x4xf32>
    %18 = arith.mulf %14, %17 : vector<1x4xf32>
    %19 = vector.broadcast %18 : vector<1x4xf32> to vector<128x4xf32>
    %20 = arith.mulf %8, %19 : vector<128x4xf32>
    %c1 = arith.constant 1 : index
    %c0_10 = arith.constant 0 : index
    %21 = vector.load %arg2[%c1, %c0_10] : memref<2x4xf32, #tpu.memory_space<vmem>>, vector<1x4xf32>
    %22 = vector.broadcast %21 : vector<1x4xf32> to vector<128x4xf32>
    %23 = arith.addf %20, %22 : vector<128x4xf32>
    %cst_11 = arith.constant 0.000000e+00 : f32
    %24 = vector.broadcast %cst_11 : f32 to vector<128x4xf32>
    %25 = arith.maximumf %23, %24 : vector<128x4xf32>
    %c0_12 = arith.constant 0 : index
    %c0_13 = arith.constant 0 : index
    %26 = vector.load %arg3[%c0_12, %c0_13] : memref<4x36xf32, #tpu.memory_space<vmem>>, vector<4x36xf32>
    %cst_14 = arith.constant dense<0.000000e+00> : vector<128x36xf32>
    %27 = tpu.matmul %25, %26, %cst_14 {dimension_numbers = #tpu.dot_dimension_numbers<[1], [0], [0], [1], [0, 0, 1, 1], [], []>} : vector<128x4xf32>, vector<4x36xf32>, vector<128x36xf32> -> vector<128x36xf32>
    %cst_15 = arith.constant 0.000000e+00 : f32
    %28 = vector.broadcast %cst_15 : f32 to vector<32x4xf32>
    %c0_16 = arith.constant 0 : index
    %c0_17 = arith.constant 0 : index
    %c0_18 = arith.constant 0 : index
    %29 = vector.load %arg4[%c0_16, %c0_17, %c0_18] : memref<9x32x128xbf16, #tpu.memory_space<vmem>>, vector<1x32x128xbf16>
    %30 = vector.shape_cast %29 : vector<1x32x128xbf16> to vector<32x128xbf16>
    %31 = arith.extf %30 : vector<32x128xbf16> to vector<32x128xf32>
    %32 = vector.extract_strided_slice %27 {offsets = [0, 0], sizes = [128, 4], strides = [1, 1]} : vector<128x36xf32> to vector<128x4xf32>
    %cst_19 = arith.constant dense<0.000000e+00> : vector<32x4xf32>
    %33 = tpu.matmul %31, %32, %cst_19 {dimension_numbers = #tpu.dot_dimension_numbers<[1], [0], [0], [1], [0, 0, 1, 1], [], []>} : vector<32x128xf32>, vector<128x4xf32>, vector<32x4xf32> -> vector<32x4xf32>
    %34 = arith.addf %28, %33 : vector<32x4xf32>
    %c1_20 = arith.constant 1 : index
    %c0_21 = arith.constant 0 : index
    %c0_22 = arith.constant 0 : index
    %35 = vector.load %arg4[%c1_20, %c0_21, %c0_22] : memref<9x32x128xbf16, #tpu.memory_space<vmem>>, vector<1x32x128xbf16>
    %36 = vector.shape_cast %35 : vector<1x32x128xbf16> to vector<32x128xbf16>
    %37 = arith.extf %36 : vector<32x128xbf16> to vector<32x128xf32>
    %38 = vector.extract_strided_slice %27 {offsets = [0, 4], sizes = [128, 4], strides = [1, 1]} : vector<128x36xf32> to vector<128x4xf32>
    %cst_23 = arith.constant dense<0.000000e+00> : vector<32x4xf32>
    %39 = tpu.matmul %37, %38, %cst_23 {dimension_numbers = #tpu.dot_dimension_numbers<[1], [0], [0], [1], [0, 0, 1, 1], [], []>} : vector<32x128xf32>, vector<128x4xf32>, vector<32x4xf32> -> vector<32x4xf32>
    %40 = arith.addf %34, %39 : vector<32x4xf32>
    %c2 = arith.constant 2 : index
    %c0_24 = arith.constant 0 : index
    %c0_25 = arith.constant 0 : index
    %41 = vector.load %arg4[%c2, %c0_24, %c0_25] : memref<9x32x128xbf16, #tpu.memory_space<vmem>>, vector<1x32x128xbf16>
    %42 = vector.shape_cast %41 : vector<1x32x128xbf16> to vector<32x128xbf16>
    %43 = arith.extf %42 : vector<32x128xbf16> to vector<32x128xf32>
    %44 = vector.extract_strided_slice %27 {offsets = [0, 8], sizes = [128, 4], strides = [1, 1]} : vector<128x36xf32> to vector<128x4xf32>
    %cst_26 = arith.constant dense<0.000000e+00> : vector<32x4xf32>
    %45 = tpu.matmul %43, %44, %cst_26 {dimension_numbers = #tpu.dot_dimension_numbers<[1], [0], [0], [1], [0, 0, 1, 1], [], []>} : vector<32x128xf32>, vector<128x4xf32>, vector<32x4xf32> -> vector<32x4xf32>
    %46 = arith.addf %40, %45 : vector<32x4xf32>
    %c3 = arith.constant 3 : index
    %c0_27 = arith.constant 0 : index
    %c0_28 = arith.constant 0 : index
    %47 = vector.load %arg4[%c3, %c0_27, %c0_28] : memref<9x32x128xbf16, #tpu.memory_space<vmem>>, vector<1x32x128xbf16>
    %48 = vector.shape_cast %47 : vector<1x32x128xbf16> to vector<32x128xbf16>
    %49 = arith.extf %48 : vector<32x128xbf16> to vector<32x128xf32>
    %50 = vector.extract_strided_slice %27 {offsets = [0, 12], sizes = [128, 4], strides = [1, 1]} : vector<128x36xf32> to vector<128x4xf32>
    %cst_29 = arith.constant dense<0.000000e+00> : vector<32x4xf32>
    %51 = tpu.matmul %49, %50, %cst_29 {dimension_numbers = #tpu.dot_dimension_numbers<[1], [0], [0], [1], [0, 0, 1, 1], [], []>} : vector<32x128xf32>, vector<128x4xf32>, vector<32x4xf32> -> vector<32x4xf32>
    %52 = arith.addf %46, %51 : vector<32x4xf32>
    %c4 = arith.constant 4 : index
    %c0_30 = arith.constant 0 : index
    %c0_31 = arith.constant 0 : index
    %53 = vector.load %arg4[%c4, %c0_30, %c0_31] : memref<9x32x128xbf16, #tpu.memory_space<vmem>>, vector<1x32x128xbf16>
    %54 = vector.shape_cast %53 : vector<1x32x128xbf16> to vector<32x128xbf16>
    %55 = arith.extf %54 : vector<32x128xbf16> to vector<32x128xf32>
    %56 = vector.extract_strided_slice %27 {offsets = [0, 16], sizes = [128, 4], strides = [1, 1]} : vector<128x36xf32> to vector<128x4xf32>
    %cst_32 = arith.constant dense<0.000000e+00> : vector<32x4xf32>
    %57 = tpu.matmul %55, %56, %cst_32 {dimension_numbers = #tpu.dot_dimension_numbers<[1], [0], [0], [1], [0, 0, 1, 1], [], []>} : vector<32x128xf32>, vector<128x4xf32>, vector<32x4xf32> -> vector<32x4xf32>
    %58 = arith.addf %52, %57 : vector<32x4xf32>
    %c5 = arith.constant 5 : index
    %c0_33 = arith.constant 0 : index
    %c0_34 = arith.constant 0 : index
    %59 = vector.load %arg4[%c5, %c0_33, %c0_34] : memref<9x32x128xbf16, #tpu.memory_space<vmem>>, vector<1x32x128xbf16>
    %60 = vector.shape_cast %59 : vector<1x32x128xbf16> to vector<32x128xbf16>
    %61 = arith.extf %60 : vector<32x128xbf16> to vector<32x128xf32>
    %62 = vector.extract_strided_slice %27 {offsets = [0, 20], sizes = [128, 4], strides = [1, 1]} : vector<128x36xf32> to vector<128x4xf32>
    %cst_35 = arith.constant dense<0.000000e+00> : vector<32x4xf32>
    %63 = tpu.matmul %61, %62, %cst_35 {dimension_numbers = #tpu.dot_dimension_numbers<[1], [0], [0], [1], [0, 0, 1, 1], [], []>} : vector<32x128xf32>, vector<128x4xf32>, vector<32x4xf32> -> vector<32x4xf32>
    %64 = arith.addf %58, %63 : vector<32x4xf32>
    %c6 = arith.constant 6 : index
    %c0_36 = arith.constant 0 : index
    %c0_37 = arith.constant 0 : index
    %65 = vector.load %arg4[%c6, %c0_36, %c0_37] : memref<9x32x128xbf16, #tpu.memory_space<vmem>>, vector<1x32x128xbf16>
    %66 = vector.shape_cast %65 : vector<1x32x128xbf16> to vector<32x128xbf16>
    %67 = arith.extf %66 : vector<32x128xbf16> to vector<32x128xf32>
    %68 = vector.extract_strided_slice %27 {offsets = [0, 24], sizes = [128, 4], strides = [1, 1]} : vector<128x36xf32> to vector<128x4xf32>
    %cst_38 = arith.constant dense<0.000000e+00> : vector<32x4xf32>
    %69 = tpu.matmul %67, %68, %cst_38 {dimension_numbers = #tpu.dot_dimension_numbers<[1], [0], [0], [1], [0, 0, 1, 1], [], []>} : vector<32x128xf32>, vector<128x4xf32>, vector<32x4xf32> -> vector<32x4xf32>
    %70 = arith.addf %64, %69 : vector<32x4xf32>
    %c7 = arith.constant 7 : index
    %c0_39 = arith.constant 0 : index
    %c0_40 = arith.constant 0 : index
    %71 = vector.load %arg4[%c7, %c0_39, %c0_40] : memref<9x32x128xbf16, #tpu.memory_space<vmem>>, vector<1x32x128xbf16>
    %72 = vector.shape_cast %71 : vector<1x32x128xbf16> to vector<32x128xbf16>
    %73 = arith.extf %72 : vector<32x128xbf16> to vector<32x128xf32>
    %74 = vector.extract_strided_slice %27 {offsets = [0, 28], sizes = [128, 4], strides = [1, 1]} : vector<128x36xf32> to vector<128x4xf32>
    %cst_41 = arith.constant dense<0.000000e+00> : vector<32x4xf32>
    %75 = tpu.matmul %73, %74, %cst_41 {dimension_numbers = #tpu.dot_dimension_numbers<[1], [0], [0], [1], [0, 0, 1, 1], [], []>} : vector<32x128xf32>, vector<128x4xf32>, vector<32x4xf32> -> vector<32x4xf32>
    %76 = arith.addf %70, %75 : vector<32x4xf32>
    %c8 = arith.constant 8 : index
    %c0_42 = arith.constant 0 : index
    %c0_43 = arith.constant 0 : index
    %77 = vector.load %arg4[%c8, %c0_42, %c0_43] : memref<9x32x128xbf16, #tpu.memory_space<vmem>>, vector<1x32x128xbf16>
    %78 = vector.shape_cast %77 : vector<1x32x128xbf16> to vector<32x128xbf16>
    %79 = arith.extf %78 : vector<32x128xbf16> to vector<32x128xf32>
    %80 = vector.extract_strided_slice %27 {offsets = [0, 32], sizes = [128, 4], strides = [1, 1]} : vector<128x36xf32> to vector<128x4xf32>
    %cst_44 = arith.constant dense<0.000000e+00> : vector<32x4xf32>
    %81 = tpu.matmul %79, %80, %cst_44 {dimension_numbers = #tpu.dot_dimension_numbers<[1], [0], [0], [1], [0, 0, 1, 1], [], []>} : vector<32x128xf32>, vector<128x4xf32>, vector<32x4xf32> -> vector<32x4xf32>
    %82 = arith.addf %76, %81 : vector<32x4xf32>
    %cst_45 = arith.constant dense<0.000000e+00> : vector<4xf32>
    %83 = vector.multi_reduction <add>, %82, %cst_45 [0] : vector<32x4xf32> to vector<4xf32>
    %84 = vector.shape_cast %83 : vector<4xf32> to vector<1x4xf32>
    %cst_46 = arith.constant 3.125000e-02 : f32
    %85 = vector.broadcast %cst_46 : f32 to vector<1x4xf32>
    %86 = arith.mulf %84, %85 : vector<1x4xf32>
    %87 = vector.broadcast %86 : vector<1x4xf32> to vector<32x4xf32>
    %88 = arith.subf %82, %87 : vector<32x4xf32>
    %89 = arith.mulf %88, %88 : vector<32x4xf32>
    %cst_47 = arith.constant dense<0.000000e+00> : vector<4xf32>
    %90 = vector.multi_reduction <add>, %89, %cst_47 [0] : vector<32x4xf32> to vector<4xf32>
    %91 = vector.shape_cast %90 : vector<4xf32> to vector<1x4xf32>
    %cst_48 = arith.constant 3.125000e-02 : f32
    %92 = vector.broadcast %cst_48 : f32 to vector<1x4xf32>
    %93 = arith.mulf %91, %92 : vector<1x4xf32>
    %c0_49 = arith.constant 0 : index
    %c0_50 = arith.constant 0 : index
    %94 = vector.load %arg5[%c0_49, %c0_50] : memref<2x4xf32, #tpu.memory_space<vmem>>, vector<1x4xf32>
    %cst_51 = arith.constant 9.99999974E-6 : f32
    %95 = vector.broadcast %cst_51 : f32 to vector<1x4xf32>
    %96 = arith.addf %93, %95 : vector<1x4xf32>
    %97 = math.rsqrt %96 : vector<1x4xf32>
    %98 = arith.mulf %94, %97 : vector<1x4xf32>
    %99 = vector.broadcast %98 : vector<1x4xf32> to vector<32x4xf32>
    %100 = arith.mulf %88, %99 : vector<32x4xf32>
    %c1_52 = arith.constant 1 : index
    %c0_53 = arith.constant 0 : index
    %101 = vector.load %arg5[%c1_52, %c0_53] : memref<2x4xf32, #tpu.memory_space<vmem>>, vector<1x4xf32>
    %102 = vector.broadcast %101 : vector<1x4xf32> to vector<32x4xf32>
    %103 = arith.addf %100, %102 : vector<32x4xf32>
    %cst_54 = arith.constant 0.000000e+00 : f32
    %104 = vector.broadcast %cst_54 : f32 to vector<32x4xf32>
    %105 = arith.maximumf %103, %104 : vector<32x4xf32>
    %c0_55 = arith.constant 0 : index
    %c0_56 = arith.constant 0 : index
    %106 = vector.load %arg6[%c0_55, %c0_56] : memref<4x36xf32, #tpu.memory_space<vmem>>, vector<4x36xf32>
    %cst_57 = arith.constant dense<0.000000e+00> : vector<32x36xf32>
    %107 = tpu.matmul %105, %106, %cst_57 {dimension_numbers = #tpu.dot_dimension_numbers<[1], [0], [0], [1], [0, 0, 1, 1], [], []>} : vector<32x4xf32>, vector<4x36xf32>, vector<32x36xf32> -> vector<32x36xf32>
    %cst_58 = arith.constant 0.000000e+00 : f32
    %108 = vector.broadcast %cst_58 : f32 to vector<8x4xf32>
    %c0_59 = arith.constant 0 : index
    %c0_60 = arith.constant 0 : index
    %c0_61 = arith.constant 0 : index
    %109 = vector.load %arg7[%c0_59, %c0_60, %c0_61] : memref<9x8x32xbf16, #tpu.memory_space<vmem>>, vector<1x8x32xbf16>
    %110 = vector.shape_cast %109 : vector<1x8x32xbf16> to vector<8x32xbf16>
    %111 = arith.extf %110 : vector<8x32xbf16> to vector<8x32xf32>
    %112 = vector.extract_strided_slice %107 {offsets = [0, 0], sizes = [32, 4], strides = [1, 1]} : vector<32x36xf32> to vector<32x4xf32>
    %cst_62 = arith.constant dense<0.000000e+00> : vector<8x4xf32>
    %113 = tpu.matmul %111, %112, %cst_62 {dimension_numbers = #tpu.dot_dimension_numbers<[1], [0], [0], [1], [0, 0, 1, 1], [], []>} : vector<8x32xf32>, vector<32x4xf32>, vector<8x4xf32> -> vector<8x4xf32>
    %114 = arith.addf %108, %113 : vector<8x4xf32>
    %c1_63 = arith.constant 1 : index
    %c0_64 = arith.constant 0 : index
    %c0_65 = arith.constant 0 : index
    %115 = vector.load %arg7[%c1_63, %c0_64, %c0_65] : memref<9x8x32xbf16, #tpu.memory_space<vmem>>, vector<1x8x32xbf16>
    %116 = vector.shape_cast %115 : vector<1x8x32xbf16> to vector<8x32xbf16>
    %117 = arith.extf %116 : vector<8x32xbf16> to vector<8x32xf32>
    %118 = vector.extract_strided_slice %107 {offsets = [0, 4], sizes = [32, 4], strides = [1, 1]} : vector<32x36xf32> to vector<32x4xf32>
    %cst_66 = arith.constant dense<0.000000e+00> : vector<8x4xf32>
    %119 = tpu.matmul %117, %118, %cst_66 {dimension_numbers = #tpu.dot_dimension_numbers<[1], [0], [0], [1], [0, 0, 1, 1], [], []>} : vector<8x32xf32>, vector<32x4xf32>, vector<8x4xf32> -> vector<8x4xf32>
    %120 = arith.addf %114, %119 : vector<8x4xf32>
    %c2_67 = arith.constant 2 : index
    %c0_68 = arith.constant 0 : index
    %c0_69 = arith.constant 0 : index
    %121 = vector.load %arg7[%c2_67, %c0_68, %c0_69] : memref<9x8x32xbf16, #tpu.memory_space<vmem>>, vector<1x8x32xbf16>
    %122 = vector.shape_cast %121 : vector<1x8x32xbf16> to vector<8x32xbf16>
    %123 = arith.extf %122 : vector<8x32xbf16> to vector<8x32xf32>
    %124 = vector.extract_strided_slice %107 {offsets = [0, 8], sizes = [32, 4], strides = [1, 1]} : vector<32x36xf32> to vector<32x4xf32>
    %cst_70 = arith.constant dense<0.000000e+00> : vector<8x4xf32>
    %125 = tpu.matmul %123, %124, %cst_70 {dimension_numbers = #tpu.dot_dimension_numbers<[1], [0], [0], [1], [0, 0, 1, 1], [], []>} : vector<8x32xf32>, vector<32x4xf32>, vector<8x4xf32> -> vector<8x4xf32>
    %126 = arith.addf %120, %125 : vector<8x4xf32>
    %c3_71 = arith.constant 3 : index
    %c0_72 = arith.constant 0 : index
    %c0_73 = arith.constant 0 : index
    %127 = vector.load %arg7[%c3_71, %c0_72, %c0_73] : memref<9x8x32xbf16, #tpu.memory_space<vmem>>, vector<1x8x32xbf16>
    %128 = vector.shape_cast %127 : vector<1x8x32xbf16> to vector<8x32xbf16>
    %129 = arith.extf %128 : vector<8x32xbf16> to vector<8x32xf32>
    %130 = vector.extract_strided_slice %107 {offsets = [0, 12], sizes = [32, 4], strides = [1, 1]} : vector<32x36xf32> to vector<32x4xf32>
    %cst_74 = arith.constant dense<0.000000e+00> : vector<8x4xf32>
    %131 = tpu.matmul %129, %130, %cst_74 {dimension_numbers = #tpu.dot_dimension_numbers<[1], [0], [0], [1], [0, 0, 1, 1], [], []>} : vector<8x32xf32>, vector<32x4xf32>, vector<8x4xf32> -> vector<8x4xf32>
    %132 = arith.addf %126, %131 : vector<8x4xf32>
    %c4_75 = arith.constant 4 : index
    %c0_76 = arith.constant 0 : index
    %c0_77 = arith.constant 0 : index
    %133 = vector.load %arg7[%c4_75, %c0_76, %c0_77] : memref<9x8x32xbf16, #tpu.memory_space<vmem>>, vector<1x8x32xbf16>
    %134 = vector.shape_cast %133 : vector<1x8x32xbf16> to vector<8x32xbf16>
    %135 = arith.extf %134 : vector<8x32xbf16> to vector<8x32xf32>
    %136 = vector.extract_strided_slice %107 {offsets = [0, 16], sizes = [32, 4], strides = [1, 1]} : vector<32x36xf32> to vector<32x4xf32>
    %cst_78 = arith.constant dense<0.000000e+00> : vector<8x4xf32>
    %137 = tpu.matmul %135, %136, %cst_78 {dimension_numbers = #tpu.dot_dimension_numbers<[1], [0], [0], [1], [0, 0, 1, 1], [], []>} : vector<8x32xf32>, vector<32x4xf32>, vector<8x4xf32> -> vector<8x4xf32>
    %138 = arith.addf %132, %137 : vector<8x4xf32>
    %c5_79 = arith.constant 5 : index
    %c0_80 = arith.constant 0 : index
    %c0_81 = arith.constant 0 : index
    %139 = vector.load %arg7[%c5_79, %c0_80, %c0_81] : memref<9x8x32xbf16, #tpu.memory_space<vmem>>, vector<1x8x32xbf16>
    %140 = vector.shape_cast %139 : vector<1x8x32xbf16> to vector<8x32xbf16>
    %141 = arith.extf %140 : vector<8x32xbf16> to vector<8x32xf32>
    %142 = vector.extract_strided_slice %107 {offsets = [0, 20], sizes = [32, 4], strides = [1, 1]} : vector<32x36xf32> to vector<32x4xf32>
    %cst_82 = arith.constant dense<0.000000e+00> : vector<8x4xf32>
    %143 = tpu.matmul %141, %142, %cst_82 {dimension_numbers = #tpu.dot_dimension_numbers<[1], [0], [0], [1], [0, 0, 1, 1], [], []>} : vector<8x32xf32>, vector<32x4xf32>, vector<8x4xf32> -> vector<8x4xf32>
    %144 = arith.addf %138, %143 : vector<8x4xf32>
    %c6_83 = arith.constant 6 : index
    %c0_84 = arith.constant 0 : index
    %c0_85 = arith.constant 0 : index
    %145 = vector.load %arg7[%c6_83, %c0_84, %c0_85] : memref<9x8x32xbf16, #tpu.memory_space<vmem>>, vector<1x8x32xbf16>
    %146 = vector.shape_cast %145 : vector<1x8x32xbf16> to vector<8x32xbf16>
    %147 = arith.extf %146 : vector<8x32xbf16> to vector<8x32xf32>
    %148 = vector.extract_strided_slice %107 {offsets = [0, 24], sizes = [32, 4], strides = [1, 1]} : vector<32x36xf32> to vector<32x4xf32>
    %cst_86 = arith.constant dense<0.000000e+00> : vector<8x4xf32>
    %149 = tpu.matmul %147, %148, %cst_86 {dimension_numbers = #tpu.dot_dimension_numbers<[1], [0], [0], [1], [0, 0, 1, 1], [], []>} : vector<8x32xf32>, vector<32x4xf32>, vector<8x4xf32> -> vector<8x4xf32>
    %150 = arith.addf %144, %149 : vector<8x4xf32>
    %c7_87 = arith.constant 7 : index
    %c0_88 = arith.constant 0 : index
    %c0_89 = arith.constant 0 : index
    %151 = vector.load %arg7[%c7_87, %c0_88, %c0_89] : memref<9x8x32xbf16, #tpu.memory_space<vmem>>, vector<1x8x32xbf16>
    %152 = vector.shape_cast %151 : vector<1x8x32xbf16> to vector<8x32xbf16>
    %153 = arith.extf %152 : vector<8x32xbf16> to vector<8x32xf32>
    %154 = vector.extract_strided_slice %107 {offsets = [0, 28], sizes = [32, 4], strides = [1, 1]} : vector<32x36xf32> to vector<32x4xf32>
    %cst_90 = arith.constant dense<0.000000e+00> : vector<8x4xf32>
    %155 = tpu.matmul %153, %154, %cst_90 {dimension_numbers = #tpu.dot_dimension_numbers<[1], [0], [0], [1], [0, 0, 1, 1], [], []>} : vector<8x32xf32>, vector<32x4xf32>, vector<8x4xf32> -> vector<8x4xf32>
    %156 = arith.addf %150, %155 : vector<8x4xf32>
    %c8_91 = arith.constant 8 : index
    %c0_92 = arith.constant 0 : index
    %c0_93 = arith.constant 0 : index
    %157 = vector.load %arg7[%c8_91, %c0_92, %c0_93] : memref<9x8x32xbf16, #tpu.memory_space<vmem>>, vector<1x8x32xbf16>
    %158 = vector.shape_cast %157 : vector<1x8x32xbf16> to vector<8x32xbf16>
    %159 = arith.extf %158 : vector<8x32xbf16> to vector<8x32xf32>
    %160 = vector.extract_strided_slice %107 {offsets = [0, 32], sizes = [32, 4], strides = [1, 1]} : vector<32x36xf32> to vector<32x4xf32>
    %cst_94 = arith.constant dense<0.000000e+00> : vector<8x4xf32>
    %161 = tpu.matmul %159, %160, %cst_94 {dimension_numbers = #tpu.dot_dimension_numbers<[1], [0], [0], [1], [0, 0, 1, 1], [], []>} : vector<8x32xf32>, vector<32x4xf32>, vector<8x4xf32> -> vector<8x4xf32>
    %162 = arith.addf %156, %161 : vector<8x4xf32>
    %c0_95 = arith.constant 0 : index
    %c0_96 = arith.constant 0 : index
    %163 = vector.load %arg8[%c0_95, %c0_96] : memref<1x4xf32, #tpu.memory_space<vmem>>, vector<1x4xf32>
    %164 = vector.broadcast %163 : vector<1x4xf32> to vector<8x4xf32>
    %165 = arith.addf %162, %164 : vector<8x4xf32>
    %cst_97 = arith.constant 0.000000e+00 : f32
    %166 = vector.broadcast %cst_97 : f32 to vector<8x4xf32>
    %167 = arith.maximumf %165, %166 : vector<8x4xf32>
    %c0_98 = arith.constant 0 : index
    %c0_99 = arith.constant 0 : index
    %168 = vector.load %arg9[%c0_98, %c0_99] : memref<4x64xf32, #tpu.memory_space<vmem>>, vector<4x64xf32>
    %cst_100 = arith.constant dense<0.000000e+00> : vector<8x64xf32>
    %169 = tpu.matmul %167, %168, %cst_100 {dimension_numbers = #tpu.dot_dimension_numbers<[1], [0], [0], [1], [0, 0, 1, 1], [], []>} : vector<8x4xf32>, vector<4x64xf32>, vector<8x64xf32> -> vector<8x64xf32>
    %cst_101 = arith.constant 0.000000e+00 : f32
    %170 = vector.broadcast %cst_101 : f32 to vector<2x16xf32>
    %c0_102 = arith.constant 0 : index
    %c0_103 = arith.constant 0 : index
    %c0_104 = arith.constant 0 : index
    %171 = vector.load %arg11[%c0_102, %c0_103, %c0_104] : memref<4x2x8xbf16, #tpu.memory_space<vmem>>, vector<1x2x8xbf16>
    %172 = vector.shape_cast %171 : vector<1x2x8xbf16> to vector<2x8xbf16>
    %173 = arith.extf %172 : vector<2x8xbf16> to vector<2x8xf32>
    %174 = vector.extract_strided_slice %169 {offsets = [0, 0], sizes = [8, 16], strides = [1, 1]} : vector<8x64xf32> to vector<8x16xf32>
    %cst_105 = arith.constant dense<0.000000e+00> : vector<2x16xf32>
    %175 = tpu.matmul %173, %174, %cst_105 {dimension_numbers = #tpu.dot_dimension_numbers<[1], [0], [0], [1], [0, 0, 1, 1], [], []>} : vector<2x8xf32>, vector<8x16xf32>, vector<2x16xf32> -> vector<2x16xf32>
    %176 = arith.addf %170, %175 : vector<2x16xf32>
    %c1_106 = arith.constant 1 : index
    %c0_107 = arith.constant 0 : index
    %c0_108 = arith.constant 0 : index
    %177 = vector.load %arg11[%c1_106, %c0_107, %c0_108] : memref<4x2x8xbf16, #tpu.memory_space<vmem>>, vector<1x2x8xbf16>
    %178 = vector.shape_cast %177 : vector<1x2x8xbf16> to vector<2x8xbf16>
    %179 = arith.extf %178 : vector<2x8xbf16> to vector<2x8xf32>
    %180 = vector.extract_strided_slice %169 {offsets = [0, 16], sizes = [8, 16], strides = [1, 1]} : vector<8x64xf32> to vector<8x16xf32>
    %cst_109 = arith.constant dense<0.000000e+00> : vector<2x16xf32>
    %181 = tpu.matmul %179, %180, %cst_109 {dimension_numbers = #tpu.dot_dimension_numbers<[1], [0], [0], [1], [0, 0, 1, 1], [], []>} : vector<2x8xf32>, vector<8x16xf32>, vector<2x16xf32> -> vector<2x16xf32>
    %182 = arith.addf %176, %181 : vector<2x16xf32>
    %c2_110 = arith.constant 2 : index
    %c0_111 = arith.constant 0 : index
    %c0_112 = arith.constant 0 : index
    %183 = vector.load %arg11[%c2_110, %c0_111, %c0_112] : memref<4x2x8xbf16, #tpu.memory_space<vmem>>, vector<1x2x8xbf16>
    %184 = vector.shape_cast %183 : vector<1x2x8xbf16> to vector<2x8xbf16>
    %185 = arith.extf %184 : vector<2x8xbf16> to vector<2x8xf32>
    %186 = vector.extract_strided_slice %169 {offsets = [0, 32], sizes = [8, 16], strides = [1, 1]} : vector<8x64xf32> to vector<8x16xf32>
    %cst_113 = arith.constant dense<0.000000e+00> : vector<2x16xf32>
    %187 = tpu.matmul %185, %186, %cst_113 {dimension_numbers = #tpu.dot_dimension_numbers<[1], [0], [0], [1], [0, 0, 1, 1], [], []>} : vector<2x8xf32>, vector<8x16xf32>, vector<2x16xf32> -> vector<2x16xf32>
    %188 = arith.addf %182, %187 : vector<2x16xf32>
    %c3_114 = arith.constant 3 : index
    %c0_115 = arith.constant 0 : index
    %c0_116 = arith.constant 0 : index
    %189 = vector.load %arg11[%c3_114, %c0_115, %c0_116] : memref<4x2x8xbf16, #tpu.memory_space<vmem>>, vector<1x2x8xbf16>
    %190 = vector.shape_cast %189 : vector<1x2x8xbf16> to vector<2x8xbf16>
    %191 = arith.extf %190 : vector<2x8xbf16> to vector<2x8xf32>
    %192 = vector.extract_strided_slice %169 {offsets = [0, 48], sizes = [8, 16], strides = [1, 1]} : vector<8x64xf32> to vector<8x16xf32>
    %cst_117 = arith.constant dense<0.000000e+00> : vector<2x16xf32>
    %193 = tpu.matmul %191, %192, %cst_117 {dimension_numbers = #tpu.dot_dimension_numbers<[1], [0], [0], [1], [0, 0, 1, 1], [], []>} : vector<2x8xf32>, vector<8x16xf32>, vector<2x16xf32> -> vector<2x16xf32>
    %194 = arith.addf %188, %193 : vector<2x16xf32>
    %c0_118 = arith.constant 0 : index
    %c0_119 = arith.constant 0 : index
    %195 = vector.load %arg10[%c0_118, %c0_119] : memref<1x16xf32, #tpu.memory_space<vmem>>, vector<1x16xf32>
    %196 = vector.broadcast %195 : vector<1x16xf32> to vector<2x16xf32>
    %197 = arith.addf %194, %196 : vector<2x16xf32>
    %c0_120 = arith.constant 0 : index
    %c0_121 = arith.constant 0 : index
    %198 = vector.load %arg14[%c0_120, %c0_121] : memref<2x16xf32, #tpu.memory_space<vmem>>, vector<2x16xf32>
    tpu.vector_store %arg14[%c0_120, %c0_121], %197 {strides = array<i32>} : memref<2x16xf32, #tpu.memory_space<vmem>>, vector<2x16xf32>,
    %199 = vector.extract_strided_slice %197 {offsets = [0, 0], sizes = [2, 8], strides = [1, 1]} : vector<2x16xf32> to vector<2x8xf32>
    %200 = vector.extract_strided_slice %197 {offsets = [0, 8], sizes = [2, 8], strides = [1, 1]} : vector<2x16xf32> to vector<2x8xf32>
    %cst_122 = arith.constant 5.000000e-01 : f32
    %201 = vector.broadcast %cst_122 : f32 to vector<2x8xf32>
    %202 = arith.mulf %201, %200 : vector<2x8xf32>
    %203 = math.exp %202 : vector<2x8xf32>
    %c0_123 = arith.constant 0 : index
    %c0_124 = arith.constant 0 : index
    %204 = vector.load %arg12[%c0_123, %c0_124] : memref<2x8xf32, #tpu.memory_space<vmem>>, vector<2x8xf32>
    %205 = arith.mulf %203, %204 : vector<2x8xf32>
    %206 = arith.addf %199, %205 : vector<2x8xf32>
    %c0_125 = arith.constant 0 : index
    %c0_126 = arith.constant 0 : index
    %207 = vector.load %arg13[%c0_125, %c0_126] : memref<2x8xf32, #tpu.memory_space<vmem>>, vector<2x8xf32>
    tpu.vector_store %arg13[%c0_125, %c0_126], %206 {strides = array<i32>} : memref<2x8xf32, #tpu.memory_space<vmem>>, vector<2x8xf32>,
    return
  }
}

</mosaic_0001>

<bundles_post_ra>
// kernel: forward.1
= control target key start
LH: loop header
LB: loop body
LE: loop exit
PB: predicated region body
PF: predicated region fallthrough
CT: control target
= control target key end

     0   :  { %vm68_vm0 = vcmask 293888   ;;  %vm117_vm1 = vcmask 1043456   ;;  %s5953_s0 = inlined_call_operand.vmem [shape: f32[128,36], index: 0, kind: input, shape index: {}]   ;;  %s5954_s1 = inlined_call_operand.vmem [shape: f32[36,4], index: 1, kind: input, shape index: {}]   ;;  %s5955_s2 = inlined_call_operand.vmem [shape: f32[2,4], index: 2, kind: input, shape index: {}]   ;;  %s5956_s3 = inlined_call_operand.vmem [shape: f32[4,36], index: 3, kind: input, shape index: {}]   ;;  %s5957_s4 = inlined_call_operand.vmem [shape: bf16[9,32,128], index: 4, kind: input, shape index: {}]   ;;  %s5958_s5 = inlined_call_operand.vmem [shape: f32[2,4], index: 5, kind: input, shape index: {}]   ;;  %s5959_s6 = inlined_call_operand.vmem [shape: f32[4,36], index: 6, kind: input, shape index: {}]   ;;  %s5960_s7 = inlined_call_operand.vmem [shape: bf16[9,8,32], index: 7, kind: input, shape index: {}]   ;;  %s5961_s8 = inlined_call_operand.vmem [shape: f32[1,4], index: 8, kind: input, shape index: {}]   ;;  %s5962_s9 = inlined_call_operand.vmem [shape: f32[4,64], index: 9, kind: input, shape index: {}]   ;;  %s5963_s10 = inlined_call_operand.vmem [shape: f32[1,16], index: 10, kind: input, shape index: {}]   ;;  %s5964_s11 = inlined_call_operand.vmem [shape: bf16[4,2,8], index: 11, kind: input, shape index: {}]   ;;  %s5965_s12 = inlined_call_operand.vmem [shape: f32[2,8], index: 12, kind: input, shape index: {}]   ;;  %s5966_s13 = inlined_call_operand.hbm [shape: f32[2,8], index: 13, kind: output, shape index: {0}]   ;;  %s5967_s14 = inlined_call_operand.vmem [shape: f32[2,16], index: 14, kind: output, shape index: {1}]  }
   0x1   :  { %v63_v0 = vld [vmem:[%s5954_s1] sm:$0xff]  ;;  %v64_v1 = vld [vmem:[%s5954_s1 + $0x8] sm:$0xff]  ;;  %v65_v2 = vld [vmem:[%s5954_s1 + $0x10] sm:$0xff] }
   0x2   :  { %v4311_v3 = vpack.c.bf16 %v64_v1, %v63_v0  ;;  %v66_v4 = vld [vmem:[%s5954_s1 + $0x18] sm:$0xff]  ;;  %v47_v5 = vld [vmem:[%s5953_s0] sm:$0xff] }
   0x3   :  { %v4315_v6 = vpack.c.bf16 %v66_v4, %v65_v2  ;;  %3787 = vmatprep.mubr.msk.f32.mxu0 %vm68_vm0, %v47_v5  ;;  %v67_v7 = vld [vmem:[%s5954_s1 + $0x20] sm:$0xf] }
   0x4   :  { %4312 = vmatprep.subr.bf16.mxu0 %v4311_v3 }
   0x5   :  { %4314 = vmatpush3.bf16.msra.mxu0 %v4311_v3 }
   0x6   :  { %4316 = vmatprep.subr.bf16.mxu0 %v4315_v6 }
   0x7   :  { %20 = vsyncpa [#allocation3], 0  ;;  %v48_v8 = vld [vmem:[%s5953_s0 + $0x8] sm:$0xff]  ;;  %v49_v9 = vld [vmem:[%s5953_s0 + $0x10] sm:$0xff]  ;;  %vm266_vm2 = vcmask 31744   ;;  %s5138_s27 = smov 112  }
   0x8   :  { %v50_v10 = vld [vmem:[%s5953_s0 + $0x18] sm:$0xff]  ;;  %v51_v11 = vld [vmem:[%s5953_s0 + $0x20] sm:$0xff]  ;;  %v52_v12 = vld [vmem:[%s5953_s0 + $0x28] sm:$0xff]  ;;  %s5139_s28 = smov 108   ;;  %s5140_s1 = smov 124   ;;  %vm5146_vm3 = vmmov 0  }
   0x9   :  { %4318 = vmatpush3.bf16.msra.mxu0 %v4315_v6  ;;  %v53_v13 = vld [vmem:[%s5953_s0 + $0x30] sm:$0xff]  ;;  %v54_v14 = vld [vmem:[%s5953_s0 + $0x38] sm:$0xff]  ;;  %v55_v15 = vld [vmem:[%s5953_s0 + $0x40] sm:$0xff]  ;;  %s5141_s29 = smov 104   ;;  %s5142_s16 = smov 100   ;;  %vm2089_vm4 = vcmask 261120  }
   0xa   :  { %3785 = vmatprep.subr.msk.mxu0 %vm117_vm1, %v67_v7  ;;  %v56_v16 = vld [vmem:[%s5953_s0 + $0x48] sm:$0xff]  ;;  %v57_v17 = vld [vmem:[%s5953_s0 + $0x50] sm:$0xff]  ;;  %v58_v18 = vld [vmem:[%s5953_s0 + $0x58] sm:$0xff]  ;;  %s5143_s17 = smov 120   ;;  %s5144_s18 = smov 96   ;;  %vm2954_vm5 = vcmask 64512  }
   0xb   :  { %v59_v19 = vld [vmem:[%s5953_s0 + $0x60] sm:$0xff]  ;;  %v60_v20 = vld [vmem:[%s5953_s0 + $0x68] sm:$0xff]  ;;  %v61_v21 = vld [vmem:[%s5953_s0 + $0x70] sm:$0xff]  ;;  %s5149_s25 = smov 8   ;;  %vm3269_vm6 = vcmask 123904   ;;  %vm3285_vm7 = vcmask 58368  }
   0xc   :  { %v62_v22 = vld [vmem:[%s5953_s0 + $0x78] sm:$0xff]  ;;  %v436_v23 = vld [vmem:[%s5956_s3] sm:$0xf] }
   0xd   :  { %3786 = vmatpush3.msk.msra.mxu0 %vm117_vm1, %v67_v7  ;;  %3811 = vmatprep.subr.msk.mxu1 %vm117_vm1, %v436_v23 }
   0xe   :  { %3788 = vmatmul.mubr.msk.f32.vlgmr.msra.gmra.mrb[0].mxu0 %vm68_vm0, %v48_v8  ;;  %3812 = vmatpush3.msk.msra.mxu1 %vm117_vm1, %v436_v23 }
   0xf   :  { %3790 = vmatprep.mubr.msk.f32.mxu0 %vm68_vm0, %v49_v9 }
  0x12   :  { %3791 = vmatmul.mubr.msk.f32.gmra.mrb[2].mxu0 %vm68_vm0, %v50_v10 }
  0x13   :  { %3793 = vmatprep.mubr.msk.f32.mxu0 %vm68_vm0, %v51_v11 }
  0x16   :  { %3794 = vmatmul.mubr.msk.f32.gmra.mrb[4].mxu0 %vm68_vm0, %v52_v12 }
  0x17   :  { %3796 = vmatprep.mubr.msk.f32.mxu0 %vm68_vm0, %v53_v13 }
  0x1a   :  { %3797 = vmatmul.mubr.msk.f32.gmra.mrb[6].mxu0 %vm68_vm0, %v54_v14 }
  0x1b   :  { %3799 = vmatprep.mubr.msk.f32.mxu0 %vm68_vm0, %v55_v15 }
  0x1e   :  { %3800 = vmatmul.mubr.msk.f32.gmra.mrb[8].mxu0 %vm68_vm0, %v56_v16 }
  0x1f   :  { %3802 = vmatprep.mubr.msk.f32.mxu0 %vm68_vm0, %v57_v17 }
  0x22   :  { %3803 = vmatmul.mubr.msk.f32.gmra.mrb[10].mxu0 %vm68_vm0, %v58_v18 }
  0x23   :  { %3805 = vmatprep.mubr.msk.f32.mxu0 %vm68_vm0, %v59_v19 }
  0x26   :  { %3806 = vmatmul.mubr.msk.f32.gmra.mrb[12].mxu0 %vm68_vm0, %v60_v20 }
  0x27   :  { %3808 = vmatprep.mubr.msk.f32.mxu0 %vm68_vm0, %v61_v21 }
  0x2a   :  { %3809 = vmatmul.mubr.msk.f32.gmra.mrb[14].mxu0 %vm68_vm0, %v62_v22 }
  0xe1   :  { %v3789_v24 = vpop.f32.mrb[0].mxu0 }
  0xe2   :  { %v268_v25 = vsel %vm266_vm2, %v3789_v24, 0.0  ;;  %v187_v26 = vpop.f32.mrb[1].mxu0 }
  0xe3   :  { %v267_v27 = vsel %vm266_vm2, %v187_v26, 0.0 }
  0xe4   :  { %v269_v28 = vadd.f32 %v268_v25, %v267_v27 }
  0xe5   :  { %v3792_v29 = vpop.f32.mrb[2].mxu0 }
  0xe6   :  { %v197_v30 = vpop.f32.mrb[3].mxu0  ;;  %v272_v33 = vsel %vm266_vm2, %v3792_v29, 0.0 }
  0xe7   :  { %v270_v31 = vsel %vm266_vm2, %v197_v30, 0.0 }
  0xe8   :  { %v271_v32 = vadd.f32 %v270_v31, %v269_v28 }
  0xe9   :  { %v3795_v34 = vpop.f32.mrb[4].mxu0 }
  0xea   :  { %v207_v35 = vpop.f32.mrb[5].mxu0  ;;  %v273_v36 = vadd.f32 %v272_v33, %v271_v32  ;;  %v276_v39 = vsel %vm266_vm2, %v3795_v34, 0.0 }
  0xeb   :  { %v274_v37 = vsel %vm266_vm2, %v207_v35, 0.0 }
  0xec   :  { %v275_v38 = vadd.f32 %v274_v37, %v273_v36 }
  0xed   :  { %v3798_v40 = vpop.f32.mrb[6].mxu0 }
  0xee   :  { %v217_v41 = vpop.f32.mrb[7].mxu0  ;;  %v277_v42 = vadd.f32 %v276_v39, %v275_v38  ;;  %v280_v45 = vsel %vm266_vm2, %v3798_v40, 0.0 }
  0xef   :  { %v278_v43 = vsel %vm266_vm2, %v217_v41, 0.0 }
  0xf0   :  { %v279_v44 = vadd.f32 %v278_v43, %v277_v42 }
  0xf1   :  { %v3801_v46 = vpop.f32.mrb[8].mxu0 }
  0xf2   :  { %v227_v47 = vpop.f32.mrb[9].mxu0  ;;  %v281_v48 = vadd.f32 %v280_v45, %v279_v44  ;;  %v284_v51 = vsel %vm266_vm2, %v3801_v46, 0.0 }
  0xf3   :  { %v282_v49 = vsel %vm266_vm2, %v227_v47, 0.0 }
  0xf4   :  { %v283_v50 = vadd.f32 %v282_v49, %v281_v48 }
  0xf5   :  { %v3804_v52 = vpop.f32.mrb[10].mxu0 }
  0xf6   :  { %v237_v53 = vpop.f32.mrb[11].mxu0  ;;  %v285_v54 = vadd.f32 %v284_v51, %v283_v50  ;;  %v288_v57 = vsel %vm266_vm2, %v3804_v52, 0.0 }
  0xf7   :  { %v286_v55 = vsel %vm266_vm2, %v237_v53, 0.0 }
  0xf8   :  { %v287_v56 = vadd.f32 %v286_v55, %v285_v54 }
  0xf9   :  { %v3807_v58 = vpop.f32.mrb[12].mxu0 }
  0xfa   :  { %v247_v59 = vpop.f32.mrb[13].mxu0  ;;  %v289_v60 = vadd.f32 %v288_v57, %v287_v56  ;;  %v292_v63 = vsel %vm266_vm2, %v3807_v58, 0.0 }
  0xfb   :  { %v290_v61 = vsel %vm266_vm2, %v247_v59, 0.0 }
  0xfc   :  { %v291_v62 = vadd.f32 %v290_v61, %v289_v60 }
  0xfd   :  { %v3810_v0 = vpop.f32.mrb[14].mxu0 }
  0xfe   :  { %v257_v1 = vpop.f32.mrb[15].mxu0  ;;  %v293_v2 = vadd.f32 %v292_v63, %v291_v62  ;;  %v296_v5 = vsel %vm266_vm2, %v3810_v0, 0.0 }
  0xff   :  { %v294_v3 = vsel %vm266_vm2, %v257_v1, 0.0 }
 0x100   :  { %v295_v4 = vadd.f32 %v294_v3, %v293_v2 }
 0x102   :  { %v297_v6 = vadd.f32 %v296_v5, %v295_v4 }
 0x104   :  { %v298_v7 = vrot.slane %v297_v6, 4 }
 0x106   :  { %v299_v8 = vadd.f32 %v298_v7, %v297_v6 }
 0x108   :  { %v300_v9 = vrot.slane %v299_v8, 2 }
 0x10a   :  { %v301_v10 = vadd.f32 %v300_v9, %v299_v8 }
 0x10c   :  { %v302_v11 = vrot.slane %v301_v10, 1 }
 0x10e   :  { %v303_v12 = vadd.f32 %v302_v11, %v301_v10 }
 0x110   :  { %v304_v13 = vmul.f32 0.0078125, %v303_v12 }
 0x112   :  { %v5328_v14 = vsub.f32 %v187_v26, %v304_v13  ;;  %v5330_v15 = vsub.f32 %v3789_v24, %v304_v13  ;;  %v5332_v16 = vsub.f32 %v197_v30, %v304_v13  ;;  %v5334_v17 = vsub.f32 %v3792_v29, %v304_v13 }
 0x113   :  { %v5336_v18 = vsub.f32 %v207_v35, %v304_v13  ;;  %v5338_v19 = vsub.f32 %v3795_v34, %v304_v13  ;;  %v5340_v20 = vsub.f32 %v217_v41, %v304_v13  ;;  %v5342_v21 = vsub.f32 %v3798_v40, %v304_v13 }
 0x114   :  { %v5344_v22 = vsub.f32 %v227_v47, %v304_v13  ;;  %v5346_v23 = vsub.f32 %v3801_v46, %v304_v13  ;;  %v5348_v25 = vsub.f32 %v237_v53, %v304_v13  ;;  %v5350_v24 = vsub.f32 %v3804_v52, %v304_v13 }
 0x115   :  { %v5352_v26 = vsub.f32 %v247_v59, %v304_v13  ;;  %v5354_v27 = vsub.f32 %v3807_v58, %v304_v13  ;;  %v5356_v28 = vsub.f32 %v257_v1, %v304_v13  ;;  %v5358_v29 = vsub.f32 %v3810_v0, %v304_v13 }
 0x116   :  { %v321_v30 = vmul.f32 %v5328_v14, %v5328_v14  ;;  %v322_v31 = vmul.f32 %v5330_v15, %v5330_v15  ;;  %v323_v32 = vmul.f32 %v5332_v16, %v5332_v16  ;;  %v324_v33 = vmul.f32 %v5334_v17, %v5334_v17 }
 0x117   :  { %v325_v37 = vmul.f32 %v5336_v18, %v5336_v18  ;;  %v326_v40 = vmul.f32 %v5338_v19, %v5338_v19  ;;  %v327_v43 = vmul.f32 %v5340_v20, %v5340_v20  ;;  %v328_v46 = vmul.f32 %v5342_v21, %v5342_v21 }
 0x118   :  { %v337_v34 = vsel %vm266_vm2, %v321_v30, 0.0  ;;  %v338_v35 = vsel %vm266_vm2, %v322_v31, 0.0  ;;  %v340_v38 = vsel %vm266_vm2, %v323_v32, 0.0  ;;  %v342_v41 = vsel %vm266_vm2, %v324_v33, 0.0 }
 0x119   :  { %v339_v36 = vadd.f32 %v338_v35, %v337_v34  ;;  %v344_v44 = vsel %vm266_vm2, %v325_v37, 0.0  ;;  %v346_v47 = vsel %vm266_vm2, %v326_v40, 0.0  ;;  %v329_v49 = vmul.f32 %v5344_v22, %v5344_v22 }
 0x11a   :  { %v348_v50 = vsel %vm266_vm2, %v327_v43, 0.0  ;;  %v330_v52 = vmul.f32 %v5346_v23, %v5346_v23  ;;  %v350_v53 = vsel %vm266_vm2, %v328_v46, 0.0  ;;  %v331_v55 = vmul.f32 %v5348_v25, %v5348_v25 }
 0x11b   :  { %v341_v39 = vadd.f32 %v340_v38, %v339_v36  ;;  %v352_v56 = vsel %vm266_vm2, %v329_v49, 0.0  ;;  %v332_v58 = vmul.f32 %v5350_v24, %v5350_v24  ;;  %v333_v61 = vmul.f32 %v5352_v26, %v5352_v26 }
 0x11c   :  { %v354_v59 = vsel %vm266_vm2, %v330_v52, 0.0  ;;  %v356_v62 = vsel %vm266_vm2, %v331_v55, 0.0  ;;  %v334_v0 = vmul.f32 %v5354_v27, %v5354_v27  ;;  %v335_v3 = vmul.f32 %v5356_v28, %v5356_v28 }
 0x11d   :  { %v343_v42 = vadd.f32 %v342_v41, %v341_v39  ;;  %v358_v1 = vsel %vm266_vm2, %v332_v58, 0.0  ;;  %v360_v4 = vsel %vm266_vm2, %v333_v61, 0.0  ;;  %v336_v6 = vmul.f32 %v5358_v29, %v5358_v29  ;;  %v375_v39 = vld [vmem:[%s5955_s2] sm:$0x1] }
 0x11e   :  { %v362_v7 = vsel %vm266_vm2, %v334_v0, 0.0  ;;  %v364_v9 = vsel %vm266_vm2, %v335_v3, 0.0  ;;  %v379_v37 = vlaneseq }
 0x11f   :  { %v345_v45 = vadd.f32 %v344_v44, %v343_v42  ;;  %v366_v11 = vsel %vm266_vm2, %v336_v6, 0.0  ;;  %v3322_v44 = vld [vmem:[%s5955_s2 + $0x1] ss:$0 sm:$0xff]  ;;  %s5137_s2 = smov 116  }
 0x120   :  { %v5408_v38 = vshrl.u32 %v379_v37, 7 }
 0x121   :  { %v347_v48 = vadd.f32 %v346_v47, %v345_v45 }
 0x122   :  { %v381_v40 = vsub.s32 0, %v5408_v38 }
 0x123   :  { %v349_v51 = vadd.f32 %v348_v50, %v347_v48 }
 0x125   :  { %v351_v54 = vadd.f32 %v350_v53, %v349_v51 }
 0x127   :  { %v353_v57 = vadd.f32 %v352_v56, %v351_v54 }
 0x129   :  { %v355_v60 = vadd.f32 %v354_v59, %v353_v57 }
 0x12b   :  { %v357_v63 = vadd.f32 %v356_v62, %v355_v60 }
 0x12d   :  { %v359_v2 = vadd.f32 %v358_v1, %v357_v63 }
 0x12f   :  { %v361_v5 = vadd.f32 %v360_v4, %v359_v2 }
 0x131   :  { %v363_v8 = vadd.f32 %v362_v7, %v361_v5 }
 0x133   :  { %v365_v10 = vadd.f32 %v364_v9, %v363_v8 }
 0x135   :  { %v367_v12 = vadd.f32 %v366_v11, %v365_v10 }
 0x137   :  { %v368_v13 = vrot.slane %v367_v12, 4 }
 0x139   :  { %v369_v30 = vadd.f32 %v368_v13, %v367_v12 }
 0x13b   :  { %v370_v31 = vrot.slane %v369_v30, 2 }
 0x13d   :  { %v371_v32 = vadd.f32 %v370_v31, %v369_v30 }
 0x13f   :  { %v372_v33 = vrot.slane %v371_v32, 1 }
 0x141   :  { %v373_v34 = vadd.f32 %v372_v33, %v371_v32 }
 0x143   :  { %v374_v35 = vmul.f32 0.0078125, %v373_v34 }
 0x145   :  { %v376_v36 = vadd.f32 1e-05, %v374_v35 }
 0x147   :  { %5107 = vrsqrt.f32 %v376_v36 }
 0x151   :  { %v5108_v41 = vpop.eup %5107 }
 0x152   :  { %v378_v42 = vmul.f32 %v5108_v41, %v375_v39 }
 0x154   :  { %v382_v43 = vrot.slane %v378_v42, %v381_v40 }
 0x156   :  { %v397_v45 = vmul.f32 %v382_v43, %v5356_v28  ;;  %v383_v46 = vmul.f32 %v382_v43, %v5328_v14  ;;  %v384_v47 = vmul.f32 %v382_v43, %v5330_v15  ;;  %v385_v48 = vmul.f32 %v382_v43, %v5332_v16 }
 0x157   :  { %v386_v49 = vmul.f32 %v382_v43, %v5334_v17  ;;  %v387_v50 = vmul.f32 %v382_v43, %v5336_v18  ;;  %v389_v51 = vmul.f32 %v382_v43, %v5340_v20  ;;  %v388_v28 = vmul.f32 %v382_v43, %v5338_v19 }
 0x158   :  { %v404_v52 = vadd.f32 %v3322_v44, %v383_v46  ;;  %v405_v53 = vadd.f32 %v3322_v44, %v384_v47  ;;  %v406_v54 = vadd.f32 %v3322_v44, %v385_v48  ;;  %v391_v16 = vmul.f32 %v382_v43, %v5344_v22 }
 0x159   :  { %v407_v57 = vadd.f32 %v3322_v44, %v386_v49  ;;  %v408_v15 = vadd.f32 %v3322_v44, %v387_v50  ;;  %v393_v17 = vmul.f32 %v382_v43, %v5348_v25  ;;  %v395_v18 = vmul.f32 %v382_v43, %v5352_v26 }
 0x15a   :  { %v420_v55 = vmax.f32 %v404_v52, 0.0  ;;  %v421_v56 = vmax.f32 %v405_v53, 0.0  ;;  %v422_v14 = vmax.f32 %v406_v54, 0.0  ;;  %v409_v58 = vadd.f32 %v3322_v44, %v388_v28 }
 0x15b   :  { %v423_v20 = vmax.f32 %v407_v57, 0.0  ;;  %v390_v59 = vmul.f32 %v382_v43, %v5342_v21  ;;  %v424_v60 = vmax.f32 %v408_v15, 0.0  ;;  %v410_v19 = vadd.f32 %v3322_v44, %v389_v51 }
 0x15c   :  { %3813 = vmatprep.mubr.msk.f32.mxu1 %vm266_vm2, %v420_v55  ;;  %v425_v61 = vmax.f32 %v409_v58, 0.0  ;;  %v392_v25 = vmul.f32 %v382_v43, %v5346_v23  ;;  %v412_v63 = vadd.f32 %v3322_v44, %v391_v16  ;;  %v394_v21 = vmul.f32 %v382_v43, %v5350_v24  ;;  %v5496_v16 = vld [vmem:[%s5957_s4 + $0x30] sm:$0xff]  }
 0x15d   :  { %3814 = vmatmul.mubr.msk.f32.vlgmr.msra.gmra.mrb[0].mxu1 %vm266_vm2, %v421_v56  ;;  %v411_v22 = vadd.f32 %v3322_v44, %v390_v59  ;;  %v426_v62 = vmax.f32 %v410_v19, 0.0  ;;  %v414_v2 = vadd.f32 %v3322_v44, %v393_v17  ;;  %v396_v23 = vmul.f32 %v382_v43, %v5354_v27  ;;  %v5566_v58 = vld [vmem:[%s5957_s4 + $0x10] sm:$0xff]  }
 0x15e   :  { %3816 = vmatprep.mubr.msk.f32.mxu1 %vm266_vm2, %v422_v14  ;;  %v413_v0 = vadd.f32 %v3322_v44, %v392_v25  ;;  %v428_v1 = vmax.f32 %v412_v63, 0.0  ;;  %v415_v4 = vadd.f32 %v3322_v44, %v394_v21  ;;  %v416_v6 = vadd.f32 %v3322_v44, %v395_v18 }
 0x15f   :  { %v427_v26 = vmax.f32 %v411_v22, 0.0  ;;  %v430_v5 = vmax.f32 %v414_v2, 0.0  ;;  %v417_v8 = vadd.f32 %v3322_v44, %v396_v23  ;;  %v398_v24 = vmul.f32 %v382_v43, %v5358_v29 }
 0x160   :  { %v429_v3 = vmax.f32 %v413_v0, 0.0  ;;  %v431_v7 = vmax.f32 %v415_v4, 0.0  ;;  %v418_v9 = vadd.f32 %v3322_v44, %v397_v45  ;;  %v432_v10 = vmax.f32 %v416_v6, 0.0 }
 0x161   :  { %3817 = vmatmul.mubr.msk.f32.gmra.mrb[2].mxu1 %vm266_vm2, %v423_v20  ;;  %v433_v11 = vmax.f32 %v417_v8, 0.0  ;;  %v419_v12 = vadd.f32 %v3322_v44, %v398_v24  ;;  %v3432_v18 = vunpack.c.l.bf16 %v5496_v16  ;;  %v3416_v59 = vunpack.c.l.bf16 %v5566_v58 }
 0x162   :  { %3819 = vmatprep.mubr.msk.f32.mxu1 %vm266_vm2, %v424_v60  ;;  %v434_v13 = vmax.f32 %v418_v9, 0.0 }
 0x163   :  { %v435_v27 = vmax.f32 %v419_v12, 0.0  ;;  %3869 = vmatprep.mubr.f32.mxu0 %v3416_v59 }
 0x165   :  { %3820 = vmatmul.mubr.msk.f32.gmra.mrb[4].mxu1 %vm266_vm2, %v425_v61 }
 0x166   :  { %3822 = vmatprep.mubr.msk.f32.mxu1 %vm266_vm2, %v426_v62 }
 0x169   :  { %3823 = vmatmul.mubr.msk.f32.gmra.mrb[6].mxu1 %vm266_vm2, %v427_v26 }
 0x16a   :  { %3825 = vmatprep.mubr.msk.f32.mxu1 %vm266_vm2, %v428_v1 }
 0x16d   :  { %3826 = vmatmul.mubr.msk.f32.gmra.mrb[8].mxu1 %vm266_vm2, %v429_v3 }
 0x16e   :  { %3828 = vmatprep.mubr.msk.f32.mxu1 %vm266_vm2, %v430_v5 }
 0x171   :  { %3829 = vmatmul.mubr.msk.f32.gmra.mrb[10].mxu1 %vm266_vm2, %v431_v7 }
 0x172   :  { %3831 = vmatprep.mubr.msk.f32.mxu1 %vm266_vm2, %v432_v10 }
 0x175   :  { %3832 = vmatmul.mubr.msk.f32.gmra.mrb[12].mxu1 %vm266_vm2, %v433_v11 }
 0x176   :  { %3834 = vmatprep.mubr.msk.f32.mxu1 %vm266_vm2, %v434_v13 }
 0x179   :  { %3835 = vmatmul.mubr.msk.f32.gmra.mrb[14].mxu1 %vm266_vm2, %v435_v27 }
 0x17a   :  { %3983 = vmatprep.mubr.f32.mxu1 %v3432_v18 }
 0x230   :  { %v3815_v30 = vpop.f32.mrb[0].mxu1 }
 0x231   :  { %v554_v31 = vpop.f32.mrb[1].mxu1 }
 0x232   :  { %v5451_v32 = vpack.i.bf16 %v3815_v30, %v554_v31  ;;  %v5455_v33 = vpack.c.bf16 %v3815_v30, %v554_v31 }
 0x234   :  { %4708 = vrot.lane.b32.xlu0 %v5451_v32, %s5137_s2  ;;  %v3818_v29 = vpop.f32.mrb[2].mxu1 }
 0x235   :  { %v564_v34 = vpop.f32.mrb[3].mxu1 }
 0x236   :  { %v5457_v35 = vpack.i.bf16 %v3818_v29, %v564_v34  ;;  %v5461_v37 = vpack.c.bf16 %v3818_v29, %v564_v34 }
 0x238   :  { %4713 = vrot.lane.b32.xlu0 %v5457_v35, %s5137_s2  ;;  %v3821_v36 = vpop.f32.mrb[4].mxu1 }
 0x239   :  { %v574_v39 = vpop.f32.mrb[5].mxu1 }
 0x23a   :  { %v5463_v41 = vpack.i.bf16 %v3821_v36, %v574_v39  ;;  %v5467_v43 = vpack.c.bf16 %v3821_v36, %v574_v39 }
 0x23c   :  { %4718 = vrot.lane.b32.xlu1 %v5463_v41, %s5137_s2  ;;  %v3824_v42 = vpop.f32.mrb[6].mxu1 }
 0x23d   :  { %v584_v44 = vpop.f32.mrb[7].mxu1 }
 0x23e   :  { %v5469_v45 = vpack.i.bf16 %v3824_v42, %v584_v44  ;;  %v5473_v47 = vpack.c.bf16 %v3824_v42, %v584_v44  ;;  %v3488_v42 = vld [vmem:[%s5957_s4 + $0x38] sm:$0xff]  }
 0x240   :  { %4723 = vrot.lane.b32.xlu1 %v5469_v45, %s5137_s2  ;;  %v3827_v46 = vpop.f32.mrb[8].mxu1 }
 0x241   :  { %v594_v48 = vpop.f32.mrb[9].mxu1 }
 0x242   :  { %v5475_v49 = vpack.i.bf16 %v3827_v46, %v594_v48  ;;  %v5479_v51 = vpack.c.bf16 %v3827_v46, %v594_v48 }
 0x244   :  { %4728 = vrot.lane.b32.xlu0 %v5475_v49, %s5137_s2  ;;  %v3830_v50 = vpop.f32.mrb[10].mxu1 }
 0x245   :  { %v604_v52 = vpop.f32.mrb[11].mxu1 }
 0x246   :  { %v5481_v53 = vpack.i.bf16 %v3830_v50, %v604_v52  ;;  %v5485_v55 = vpack.c.bf16 %v3830_v50, %v604_v52  ;;  %v3433_v50 = vunpack.c.h.bf16 %v5496_v16  ;;  %v3436_v52 = vunpack.c.l.bf16 %v3488_v42 }
 0x248   :  { %4733 = vrot.lane.b32.xlu1 %v5481_v53, %s5137_s2  ;;  %v3833_v54 = vpop.f32.mrb[12].mxu1 }
 0x249   :  { %v614_v56 = vpop.f32.mrb[13].mxu1 }
 0x24a   :  { %v5487_v57 = vpack.i.bf16 %v3833_v54, %v614_v56  ;;  %v5491_v14 = vpack.c.bf16 %v3833_v54, %v614_v56 }
 0x24c   :  { %4738 = vrot.lane.b32.xlu0 %v5487_v57, %s5137_s2  ;;  %v3836_v28 = vpop.f32.mrb[14].mxu1 }
 0x24d   :  { %v624_v15 = vpop.f32.mrb[15].mxu1 }
 0x24e   :  { %v5498_v17 = vpack.i.bf16 %v3836_v28, %v624_v15  ;;  %v5505_v20 = vpack.c.bf16 %v3836_v28, %v624_v15 }
 0x250   :  { %4748 = vrot.lane.b32.xlu0 %v5451_v32, %s5138_s27  ;;  %4743 = vrot.lane.b32.xlu1 %v5498_v17, %s5137_s2 }
 0x254   :  { %4758 = vrot.lane.b32.xlu0 %v5463_v41, %s5138_s27  ;;  %4753 = vrot.lane.b32.xlu1 %v5457_v35, %s5138_s27 }
 0x258   :  { %4768 = vrot.lane.b32.xlu0 %v5475_v49, %s5138_s27  ;;  %4763 = vrot.lane.b32.xlu1 %v5469_v45, %s5138_s27 }
 0x25c   :  { %4778 = vrot.lane.b32.xlu0 %v5487_v57, %s5138_s27  ;;  %4773 = vrot.lane.b32.xlu1 %v5481_v53, %s5138_s27 }
 0x260   :  { %4788 = vrot.lane.b32.xlu0 %v5451_v32, %s5139_s28  ;;  %4783 = vrot.lane.b32.xlu1 %v5498_v17, %s5138_s27 }
 0x264   :  { %4798 = vrot.lane.b32.xlu0 %v5463_v41, %s5139_s28  ;;  %4793 = vrot.lane.b32.xlu1 %v5457_v35, %s5139_s28 }
 0x268   :  { %4808 = vrot.lane.b32.xlu0 %v5475_v49, %s5139_s28  ;;  %4803 = vrot.lane.b32.xlu1 %v5469_v45, %s5139_s28 }
 0x26c   :  { %4818 = vrot.lane.b32.xlu0 %v5487_v57, %s5139_s28  ;;  %4813 = vrot.lane.b32.xlu1 %v5481_v53, %s5139_s28 }
 0x270   :  { %4823 = vrot.lane.b32.xlu0 %v5451_v32, %s5140_s1  ;;  %4828 = vrot.lane.b32.xlu1 %v5498_v17, %s5139_s28 }
 0x274   :  { %4838 = vrot.lane.b32.xlu0 %v5457_v35, %s5140_s1  ;;  %4833 = vrot.lane.b32.xlu1 %v5451_v32, %s5141_s29 }
 0x278   :  { %4848 = vrot.lane.b32.xlu0 %v5463_v41, %s5140_s1  ;;  %4843 = vrot.lane.b32.xlu1 %v5457_v35, %s5141_s29 }
 0x27c   :  { %4858 = vrot.lane.b32.xlu0 %v5469_v45, %s5140_s1  ;;  %4853 = vrot.lane.b32.xlu1 %v5463_v41, %s5141_s29 }
 0x280   :  { %4868 = vrot.lane.b32.xlu0 %v5475_v49, %s5140_s1  ;;  %4863 = vrot.lane.b32.xlu1 %v5469_v45, %s5141_s29 }
 0x284   :  { %4878 = vrot.lane.b32.xlu0 %v5481_v53, %s5140_s1  ;;  %4873 = vrot.lane.b32.xlu1 %v5475_v49, %s5141_s29 }
 0x288   :  { %4888 = vrot.lane.b32.xlu0 %v5487_v57, %s5140_s1  ;;  %4883 = vrot.lane.b32.xlu1 %v5481_v53, %s5141_s29 }
 0x28c   :  { %4898 = vrot.lane.b32.xlu0 %v5498_v17, %s5140_s1  ;;  %4893 = vrot.lane.b32.xlu1 %v5487_v57, %s5141_s29 }
 0x290   :  { %4908 = vrot.lane.b32.xlu0 %v5451_v32, %s5142_s16  ;;  %4903 = vrot.lane.b32.xlu1 %v5498_v17, %s5141_s29 }
 0x294   :  { %4918 = vrot.lane.b32.xlu0 %v5463_v41, %s5142_s16  ;;  %4913 = vrot.lane.b32.xlu1 %v5457_v35, %s5142_s16 }
 0x298   :  { %4928 = vrot.lane.b32.xlu0 %v5475_v49, %s5142_s16  ;;  %4923 = vrot.lane.b32.xlu1 %v5469_v45, %s5142_s16 }
 0x29c   :  { %4938 = vrot.lane.b32.xlu0 %v5487_v57, %s5142_s16  ;;  %4933 = vrot.lane.b32.xlu1 %v5481_v53, %s5142_s16 }
 0x2a0   :  { %4943 = vrot.lane.b32.xlu0 %v5451_v32, %s5143_s17  ;;  %4948 = vrot.lane.b32.xlu1 %v5498_v17, %s5142_s16 }
 0x2a4   :  { %4958 = vrot.lane.b32.xlu0 %v5457_v35, %s5143_s17  ;;  %4953 = vrot.lane.b32.xlu1 %v5451_v32, %s5144_s18 }
 0x2a6   :  { %v4709_v60 = vpop.permute.xlu0 %4708 }
 0x2a7   :  { %v4711_v19 = vunpack.i.h.bf16 %v4709_v60  ;;  %v4710_v61 = vunpack.i.l.bf16 %v4709_v60 }
 0x2a8   :  { %4968 = vrot.lane.b32.xlu0 %v5463_v41, %s5143_s17  ;;  %4963 = vrot.lane.b32.xlu1 %v5457_v35, %s5144_s18 }
 0x2a9   :  { %v4415_v22 = vpack.c.bf16 %v4711_v19, %v4710_v61 }
 0x2aa   :  { %v4714_v25 = vpop.permute.xlu0 %4713 }
 0x2ab   :  { %v4716_v62 = vunpack.i.h.bf16 %v4714_v25  ;;  %v4715_v63 = vunpack.i.l.bf16 %v4714_v25  ;;  %4416 = vmatprep.subr.bf16.mxu1 %v4415_v22 }
 0x2ac   :  { %4418 = vmatpush3.bf16.msra.mxu1 %v4415_v22  ;;  %4978 = vrot.lane.b32.xlu0 %v5469_v45, %s5143_s17 }
 0x2ad   :  { %v4419_v26 = vpack.c.bf16 %v4716_v62, %v4715_v63  ;;  %4973 = vrot.lane.b32.xlu1 %v5463_v41, %s5144_s18 }
 0x2ae   :  { %v4719_v0 = vpop.permute.xlu1 %4718 }
 0x2af   :  { %v4721_v21 = vunpack.i.h.bf16 %v4719_v0  ;;  %v4720_v1 = vunpack.i.l.bf16 %v4719_v0  ;;  %4420 = vmatprep.subr.bf16.mxu1 %v4419_v26 }
 0x2b0   :  { %4422 = vmatpush3.bf16.msra.mxu1 %v4419_v26  ;;  %4988 = vrot.lane.b32.xlu0 %v5475_v49, %s5143_s17 }
 0x2b1   :  { %v4423_v2 = vpack.c.bf16 %v4721_v21, %v4720_v1  ;;  %4983 = vrot.lane.b32.xlu1 %v5469_v45, %s5144_s18 }
 0x2b2   :  { %v4724_v3 = vpop.permute.xlu1 %4723 }
 0x2b3   :  { %v4726_v4 = vunpack.i.h.bf16 %v4724_v3  ;;  %v4725_v23 = vunpack.i.l.bf16 %v4724_v3  ;;  %4424 = vmatprep.subr.bf16.mxu1 %v4423_v2 }
 0x2b4   :  { %4426 = vmatpush3.bf16.msra.mxu1 %v4423_v2  ;;  %4998 = vrot.lane.b32.xlu0 %v5481_v53, %s5143_s17 }
 0x2b5   :  { %v4427_v5 = vpack.c.bf16 %v4726_v4, %v4725_v23  ;;  %4993 = vrot.lane.b32.xlu1 %v5475_v49, %s5144_s18 }
 0x2b6   :  { %v4729_v6 = vpop.permute.xlu0 %4728 }
 0x2b7   :  { %v4731_v7 = vunpack.i.h.bf16 %v4729_v6  ;;  %v4730_v8 = vunpack.i.l.bf16 %v4729_v6  ;;  %4428 = vmatprep.subr.bf16.mxu1 %v4427_v5 }
 0x2b8   :  { %4430 = vmatpush3.bf16.msra.mxu1 %v4427_v5  ;;  %5008 = vrot.lane.b32.xlu0 %v5487_v57, %s5143_s17 }
 0x2b9   :  { %v4431_v24 = vpack.c.bf16 %v4731_v7, %v4730_v8  ;;  %5003 = vrot.lane.b32.xlu1 %v5481_v53, %s5144_s18  ;;  %v5630_v53 = vld [vmem:[%s5957_s4 + $0x40] sm:$0xff]  }
 0x2ba   :  { %v4734_v9 = vpop.permute.xlu1 %4733  ;;  %v3440_v18 = vunpack.c.l.bf16 %v5630_v53 }
 0x2bb   :  { %v4736_v10 = vunpack.i.h.bf16 %v4734_v9  ;;  %v4735_v11 = vunpack.i.l.bf16 %v4734_v9  ;;  %4432 = vmatprep.subr.bf16.mxu1 %v4431_v24 }
 0x2bc   :  { %4434 = vmatpush3.bf16.msra.mxu1 %v4431_v24  ;;  %5018 = vrot.lane.b32.xlu0 %v5498_v17, %s5143_s17 }
 0x2bd   :  { %v4435_v12 = vpack.c.bf16 %v4736_v10, %v4735_v11  ;;  %5013 = vrot.lane.b32.xlu1 %v5487_v57, %s5144_s18 }
 0x2be   :  { %v4739_v13 = vpop.permute.xlu0 %4738 }
 0x2bf   :  { %v4741_v27 = vunpack.i.h.bf16 %v4739_v13  ;;  %v4740_v30 = vunpack.i.l.bf16 %v4739_v13  ;;  %4436 = vmatprep.subr.bf16.mxu1 %v4435_v12 }
 0x2c0   :  { %4438 = vmatpush3.bf16.msra.mxu1 %v4435_v12 }
 0x2c1   :  { %v4439_v31 = vpack.c.bf16 %v4741_v27, %v4740_v30  ;;  %5023 = vrot.lane.b32.xlu1 %v5498_v17, %s5144_s18  ;;  %v3437_v17 = vunpack.c.h.bf16 %v3488_v42 }
 0x2c2   :  { %v4749_v32 = vpop.permute.xlu0 %4748  ;;  %v4744_v29 = vpop.permute.xlu1 %4743 }
 0x2c3   :  { %v4751_v34 = vunpack.i.h.bf16 %v4749_v32  ;;  %v4750_v35 = vunpack.i.l.bf16 %v4749_v32  ;;  %v4746_v36 = vunpack.i.h.bf16 %v4744_v29  ;;  %v4745_v39 = vunpack.i.l.bf16 %v4744_v29  ;;  %4440 = vmatprep.subr.bf16.mxu1 %v4439_v31 }
 0x2c4   :  { %4442 = vmatpush3.bf16.msra.mxu1 %v4439_v31 }
 0x2c5   :  { %v4443_v41 = vpack.c.bf16 %v4746_v36, %v4745_v39  ;;  %v4447_v46 = vpack.c.bf16 %v4751_v34, %v4750_v35  ;;  %v3441_v39 = vunpack.c.h.bf16 %v5630_v53 }
 0x2c6   :  { %v4759_v44 = vpop.permute.xlu0 %4758  ;;  %v4754_v45 = vpop.permute.xlu1 %4753 }
 0x2c7   :  { %v4756_v48 = vunpack.i.h.bf16 %v4754_v45  ;;  %v4755_v49 = vunpack.i.l.bf16 %v4754_v45  ;;  %4444 = vmatprep.subr.bf16.mxu1 %v4443_v41  ;;  %v4761_v57 = vunpack.i.h.bf16 %v4759_v44  ;;  %v4760_v28 = vunpack.i.l.bf16 %v4759_v44 }
 0x2c8   :  { %4446 = vmatpush3.bf16.msra.mxu1 %v4443_v41  ;;  %v3490_v41 = vld [vmem:[%s5957_s4 + $0x48] sm:$0xff]  }
 0x2c9   :  { %4448 = vmatprep.subr.bf16.mxu1 %v4447_v46  ;;  %v4451_v15 = vpack.c.bf16 %v4756_v48, %v4755_v49  ;;  %v4455_v60 = vpack.c.bf16 %v4761_v57, %v4760_v28  ;;  %v3444_v49 = vunpack.c.l.bf16 %v3490_v41 }
 0x2ca   :  { %v4769_v54 = vpop.permute.xlu0 %4768  ;;  %v4764_v56 = vpop.permute.xlu1 %4763 }
 0x2cb   :  { %3984 = vmatmul.mubr.f32.vlgmr.msra.gmra.mrb[16].mxu1 %v3433_v50  ;;  %v4766_v19 = vunpack.i.h.bf16 %v4764_v56  ;;  %v4765_v61 = vunpack.i.l.bf16 %v4764_v56  ;;  %v4771_v62 = vunpack.i.h.bf16 %v4769_v54  ;;  %v4770_v63 = vunpack.i.l.bf16 %v4769_v54  ;;  %v5656_v56 = vld [vmem:[%s5957_s4 + $0x50] sm:$0xff]  }
 0x2cc   :  { %4450 = vmatpush3.bf16.msra.mxu1 %v4447_v46  ;;  %3986 = vmatprep.mubr.f32.mxu1 %v3436_v52 }
 0x2cd   :  { %4452 = vmatprep.subr.bf16.mxu1 %v4451_v15  ;;  %v4459_v26 = vpack.c.bf16 %v4766_v19, %v4765_v61  ;;  %v4463_v1 = vpack.c.bf16 %v4771_v62, %v4770_v63 }
 0x2ce   :  { %v4779_v16 = vpop.permute.xlu0 %4778  ;;  %v4774_v59 = vpop.permute.xlu1 %4773 }
 0x2cf   :  { %3987 = vmatmul.mubr.f32.gmra.mrb[18].mxu1 %v3437_v17  ;;  %v4776_v2 = vunpack.i.h.bf16 %v4774_v59  ;;  %v4775_v3 = vunpack.i.l.bf16 %v4774_v59  ;;  %v4781_v5 = vunpack.i.h.bf16 %v4779_v16  ;;  %v4780_v6 = vunpack.i.l.bf16 %v4779_v16 }
 0x2d0   :  { %4454 = vmatpush3.bf16.msra.mxu1 %v4451_v15  ;;  %4021 = vmatprep.mubr.f32.mxu1 %v3440_v18  ;;  %v3445_v17 = vunpack.c.h.bf16 %v3490_v41  ;;  %v3448_v16 = vunpack.c.l.bf16 %v5656_v56 }
 0x2d1   :  { %4456 = vmatprep.subr.bf16.mxu1 %v4455_v60  ;;  %v4467_v7 = vpack.c.bf16 %v4776_v2, %v4775_v3  ;;  %v4471_v9 = vpack.c.bf16 %v4781_v5, %v4780_v6 }
 0x2d2   :  { %v4789_v22 = vpop.permute.xlu0 %4788  ;;  %v4784_v25 = vpop.permute.xlu1 %4783 }
 0x2d3   :  { %v4786_v10 = vunpack.i.h.bf16 %v4784_v25  ;;  %v4785_v11 = vunpack.i.l.bf16 %v4784_v25  ;;  %v4791_v12 = vunpack.i.h.bf16 %v4789_v22  ;;  %v4790_v13 = vunpack.i.l.bf16 %v4789_v22 }
 0x2d4   :  { %4458 = vmatpush3.bf16.msra.mxu1 %v4455_v60 }
 0x2d5   :  { %4460 = vmatprep.subr.bf16.mxu1 %v4459_v26  ;;  %v4475_v30 = vpack.c.bf16 %v4786_v10, %v4785_v11  ;;  %v4479_v35 = vpack.c.bf16 %v4791_v12, %v4790_v13 }
 0x2d6   :  { %v5633_v0 = vpop.permute.xlu0 %4798  ;;  %v4794_v21 = vpop.permute.xlu1 %4793 }
 0x2d7   :  { %v4796_v42 = vunpack.i.h.bf16 %v4794_v21  ;;  %v4795_v44 = vunpack.i.l.bf16 %v4794_v21  ;;  %v4801_v50 = vunpack.i.h.bf16 %v5633_v0  ;;  %v4800_v52 = vunpack.i.l.bf16 %v5633_v0 }
 0x2d8   :  { %4462 = vmatpush3.bf16.msra.mxu1 %v4459_v26 }
 0x2d9   :  { %4464 = vmatprep.subr.bf16.mxu1 %v4463_v1  ;;  %v4483_v57 = vpack.c.bf16 %v4796_v42, %v4795_v44  ;;  %v4487_v59 = vpack.c.bf16 %v4801_v50, %v4800_v52 }
 0x2da   :  { %v5635_v4 = vpop.permute.xlu0 %4808  ;;  %v5637_v23 = vpop.permute.xlu1 %4803 }
 0x2db   :  { %v4806_v19 = vunpack.i.h.bf16 %v5637_v23  ;;  %v4805_v61 = vunpack.i.l.bf16 %v5637_v23  ;;  %v4811_v26 = vunpack.i.h.bf16 %v5635_v4  ;;  %v4810_v0 = vunpack.i.l.bf16 %v5635_v4 }
 0x2dc   :  { %4466 = vmatpush3.bf16.msra.mxu1 %v4463_v1 }
 0x2dd   :  { %4468 = vmatprep.subr.bf16.mxu1 %v4467_v7  ;;  %v4491_v1 = vpack.c.bf16 %v4806_v19, %v4805_v61  ;;  %v4495_v5 = vpack.c.bf16 %v4811_v26, %v4810_v0 }
 0x2de   :  { %v5639_v8 = vpop.permute.xlu0 %4818  ;;  %v5641_v24 = vpop.permute.xlu1 %4813 }
 0x2df   :  { %v4815_v10 = vunpack.i.l.bf16 %v5641_v24  ;;  %v4821_v13 = vunpack.i.h.bf16 %v5639_v8 }
 0x2e0   :  { %4470 = vmatpush3.bf16.msra.mxu1 %v4467_v7 }
 0x2e1   :  { %4472 = vmatprep.subr.bf16.mxu1 %v4471_v9 }
 0x2e2   :  { %v4824_v27 = vpop.permute.xlu0 %4823  ;;  %v5643_v29 = vpop.permute.xlu1 %4828 }
 0x2e3   :  { %v4826_v31 = vunpack.i.h.bf16 %v4824_v27  ;;  %v4825_v32 = vunpack.i.l.bf16 %v4824_v27  ;;  %v4820_v27 = vunpack.i.l.bf16 %v5639_v8  ;;  %v4831_v41 = vunpack.i.h.bf16 %v5643_v29 }
 0x2e4   :  { %4474 = vmatpush3.bf16.msra.mxu1 %v4471_v9  ;;  %v4816_v9 = vunpack.i.h.bf16 %v5641_v24  ;;  %v4830_v42 = vunpack.i.l.bf16 %v5643_v29  ;;  %v3484_v29 = vld [vmem:[%s5957_s4 + $0x18] sm:$0xff]  }
 0x2e5   :  { %v4319_v34 = vpack.c.bf16 %v4826_v31, %v4825_v32  ;;  %4476 = vmatprep.subr.bf16.mxu1 %v4475_v30 }
 0x2e6   :  { %v4839_v36 = vpop.permute.xlu0 %4838  ;;  %v5651_v54 = vpop.permute.xlu1 %4833  ;;  %v4499_v31 = vpack.c.bf16 %v4816_v9, %v4815_v10 }
 0x2e7   :  { %v4841_v45 = vunpack.i.h.bf16 %v4839_v36  ;;  %v4840_v46 = vunpack.i.l.bf16 %v4839_v36  ;;  %4320 = vmatprep.subr.bf16.mxu0 %v4319_v34  ;;  %v4503_v36 = vpack.c.bf16 %v4821_v13, %v4820_v27  ;;  %v4836_v50 = vunpack.i.h.bf16 %v5651_v54 }
 0x2e8   :  { %4322 = vmatpush3.bf16.msra.mxu0 %v4319_v34  ;;  %4478 = vmatpush3.bf16.msra.mxu1 %v4475_v30  ;;  %v4835_v52 = vunpack.i.l.bf16 %v5651_v54 }
 0x2e9   :  { %v4323_v48 = vpack.c.bf16 %v4841_v45, %v4840_v46  ;;  %4480 = vmatprep.subr.bf16.mxu1 %v4479_v35 }
 0x2ea   :  { %v4849_v53 = vpop.permute.xlu0 %4848  ;;  %v5661_v62 = vpop.permute.xlu1 %4843 }
 0x2eb   :  { %v4851_v28 = vunpack.i.h.bf16 %v4849_v53  ;;  %v4850_v15 = vunpack.i.l.bf16 %v4849_v53  ;;  %4324 = vmatprep.subr.bf16.mxu0 %v4323_v48  ;;  %4022 = vmatmul.mubr.f32.vlgmr.msra.gmra.mrb[16].mxu1 %v3441_v39  ;;  %v3417_v53 = vunpack.c.h.bf16 %v5566_v58  ;;  %v4846_v54 = vunpack.i.h.bf16 %v5661_v62 }
 0x2ec   :  { %4326 = vmatpush3.bf16.msra.mxu0 %v4323_v48  ;;  %4482 = vmatpush3.bf16.msra.mxu1 %v4479_v35  ;;  %v3421_v58 = vunpack.c.h.bf16 %v3484_v29 }
 0x2ed   :  { %v4327_v18 = vpack.c.bf16 %v4851_v28, %v4850_v15  ;;  %4484 = vmatprep.subr.bf16.mxu1 %v4483_v57  ;;  %4024 = vmatprep.mubr.f32.mxu1 %v3444_v49  ;;  %v4507_v49 = vpack.c.bf16 %v4831_v41, %v4830_v42  ;;  %v3449_v28 = vunpack.c.h.bf16 %v5656_v56  ;;  %v3420_v15 = vunpack.c.l.bf16 %v3484_v29  ;;  %v5745_v29 = vld [vmem:[%s5957_s4 + $0x20] sm:$0xff]  }
 0x2ee   :  { %v4859_v60 = vpop.permute.xlu0 %4858  ;;  %v5665_v6 = vpop.permute.xlu1 %4853 }
 0x2ef   :  { %v4861_v22 = vunpack.i.h.bf16 %v4859_v60  ;;  %v4860_v25 = vunpack.i.l.bf16 %v4859_v60  ;;  %4328 = vmatprep.subr.bf16.mxu0 %v4327_v18  ;;  %4025 = vmatmul.mubr.f32.gmra.mrb[18].mxu1 %v3445_v17  ;;  %v4511_v17 = vpack.c.bf16 %v4836_v50, %v4835_v52 }
 0x2f0   :  { %4330 = vmatpush3.bf16.msra.mxu0 %v4327_v18  ;;  %4486 = vmatpush3.bf16.msra.mxu1 %v4483_v57  ;;  %v4845_v18 = vunpack.i.l.bf16 %v5661_v62  ;;  %v4855_v62 = vunpack.i.l.bf16 %v5665_v6 }
 0x2f1   :  { %v4331_v63 = vpack.c.bf16 %v4861_v22, %v4860_v25  ;;  %4488 = vmatprep.subr.bf16.mxu1 %v4487_v59  ;;  %4059 = vmatprep.mubr.f32.mxu1 %v3448_v16  ;;  %v5694_v16 = vld [vmem:[%s5957_s4] sm:$0xff]   ;;  %v4856_v25 = vunpack.i.h.bf16 %v5665_v6 }
 0x2f2   :  { %v4869_v21 = vpop.permute.xlu0 %4868  ;;  %v5671_v35 = vpop.permute.xlu1 %4863  ;;  %v3408_v19 = vunpack.c.l.bf16 %v5694_v16  ;;  %v4515_v22 = vpack.c.bf16 %v4846_v54, %v4845_v18  ;;  %v3494_v54 = vld [vmem:[%s5957_s4 + $0x68] sm:$0xff]   ;;  %v3424_v18 = vunpack.c.l.bf16 %v5745_v29 }
 0x2f3   :  { %v4871_v2 = vunpack.i.h.bf16 %v4869_v21  ;;  %v4870_v3 = vunpack.i.l.bf16 %v4869_v21  ;;  %4332 = vmatprep.subr.bf16.mxu0 %v4331_v63 }
 0x2f4   :  { %4334 = vmatpush3.bf16.msra.mxu0 %v4331_v63  ;;  %4490 = vmatpush3.bf16.msra.mxu1 %v4487_v59  ;;  %v3492_v59 = vld [vmem:[%s5957_s4 + $0x58] sm:$0xff]  }
 0x2f5   :  { %v4335_v23 = vpack.c.bf16 %v4871_v2, %v4870_v3  ;;  %4492 = vmatprep.subr.bf16.mxu1 %v4491_v1  ;;  %v3452_v61 = vunpack.c.l.bf16 %v3492_v59  ;;  %v3453_v63 = vunpack.c.h.bf16 %v3492_v59  ;;  %v4866_v2 = vunpack.i.h.bf16 %v5671_v35 }
 0x2f6   :  { %v4879_v7 = vpop.permute.xlu0 %4878  ;;  %v5675_v46 = vpop.permute.xlu1 %4873  ;;  %v4865_v3 = vunpack.i.l.bf16 %v5671_v35  ;;  %v3460_v59 = vunpack.c.l.bf16 %v3494_v54 }
 0x2f7   :  { %v4881_v11 = vunpack.i.h.bf16 %v4879_v7  ;;  %v4880_v12 = vunpack.i.l.bf16 %v4879_v7  ;;  %4336 = vmatprep.subr.bf16.mxu0 %v4335_v23  ;;  %v4875_v6 = vunpack.i.l.bf16 %v5675_v46 }
 0x2f8   :  { %4338 = vmatpush3.bf16.msra.mxu0 %v4335_v23  ;;  %4494 = vmatpush3.bf16.msra.mxu1 %v4491_v1  ;;  %v4519_v1 = vpack.c.bf16 %v4856_v25, %v4855_v62  ;;  %v4523_v23 = vpack.c.bf16 %v4866_v2, %v4865_v3  ;;  %v5756_v62 = vld [vmem:[%s5957_s4 + $0x70] sm:$0xff]  }
 0x2f9   :  { %v4339_v4 = vpack.c.bf16 %v4881_v11, %v4880_v12  ;;  %4496 = vmatprep.subr.bf16.mxu1 %v4495_v5 }
 0x2fa   :  { %v4889_v30 = vpop.permute.xlu0 %4888  ;;  %v4884_v60 = vpop.permute.xlu1 %4883 }
 0x2fb   :  { %v4891_v32 = vunpack.i.h.bf16 %v4889_v30  ;;  %v4890_v34 = vunpack.i.l.bf16 %v4889_v30  ;;  %4340 = vmatprep.subr.bf16.mxu0 %v4339_v4  ;;  %v4886_v10 = vunpack.i.h.bf16 %v4884_v60  ;;  %v4885_v11 = vunpack.i.l.bf16 %v4884_v60 }
 0x2fc   :  { %4342 = vmatpush3.bf16.msra.mxu0 %v4339_v4  ;;  %4498 = vmatpush3.bf16.msra.mxu1 %v4495_v5  ;;  %v4876_v5 = vunpack.i.h.bf16 %v5675_v46  ;;  %v3461_v60 = vunpack.c.h.bf16 %v3494_v54 }
 0x2fd   :  { %v4343_v24 = vpack.c.bf16 %v4891_v32, %v4890_v34  ;;  %4500 = vmatprep.subr.bf16.mxu1 %v4499_v31  ;;  %v4531_v30 = vpack.c.bf16 %v4886_v10, %v4885_v11 }
 0x2fe   :  { %v4899_v39 = vpop.permute.xlu0 %4898  ;;  %v4894_v26 = vpop.permute.xlu1 %4893 }
 0x2ff   :  { %v4901_v44 = vunpack.i.h.bf16 %v4899_v39  ;;  %v4900_v45 = vunpack.i.l.bf16 %v4899_v39  ;;  %4344 = vmatprep.subr.bf16.mxu0 %v4343_v24  ;;  %v4896_v12 = vunpack.i.h.bf16 %v4894_v26  ;;  %v4895_v4 = vunpack.i.l.bf16 %v4894_v26 }
 0x300   :  { %4346 = vmatpush3.bf16.msra.mxu0 %v4343_v24  ;;  %4502 = vmatpush3.bf16.msra.mxu1 %v4499_v31  ;;  %v3409_v39 = vunpack.c.h.bf16 %v5694_v16 }
 0x301   :  { %v4347_v8 = vpack.c.bf16 %v4901_v44, %v4900_v45  ;;  %4504 = vmatprep.subr.bf16.mxu1 %v4503_v36 }
 0x302   :  { %v5677_v48 = vpop.permute.xlu0 %4908  ;;  %v4904_v7 = vpop.permute.xlu1 %4903 }
 0x303   :  { %4348 = vmatprep.subr.bf16.mxu0 %v4347_v8  ;;  %v4906_v31 = vunpack.i.h.bf16 %v4904_v7  ;;  %v4905_v32 = vunpack.i.l.bf16 %v4904_v7 }
 0x304   :  { %4350 = vmatpush3.bf16.msra.mxu0 %v4347_v8  ;;  %4506 = vmatpush3.bf16.msra.mxu1 %v4503_v36  ;;  %v4910_v36 = vunpack.i.l.bf16 %v5677_v48  ;;  %v3482_v8 = vld [vmem:[%s5957_s4 + $0x8] sm:$0xff]  }
 0x305   :  { %4352 = vmatprep.subr.bf16.mxu0 %v5455_v33  ;;  %4508 = vmatprep.subr.bf16.mxu1 %v4507_v49  ;;  %v4539_v41 = vpack.c.bf16 %v4906_v31, %v4905_v32  ;;  %v3412_v52 = vunpack.c.l.bf16 %v3482_v8 }
 0x306   :  { %v5686_v57 = vpop.permute.xlu0 %4918  ;;  %v4914_v13 = vpop.permute.xlu1 %4913 }
 0x307   :  { %3870 = vmatmul.mubr.f32.vlgmr.msra.gmra.mrb[16].mxu0 %v3417_v53  ;;  %v3413_v53 = vunpack.c.h.bf16 %v3482_v8  ;;  %v4920_v16 = vunpack.i.l.bf16 %v5686_v57 }
 0x308   :  { %4354 = vmatpush3.bf16.msra.mxu0 %v5455_v33  ;;  %4510 = vmatpush3.bf16.msra.mxu1 %v4507_v49  ;;  %v5709_v33 = vld [vmem:[%s5957_s4 + $0x60] sm:$0xff]   ;;  %v4916_v49 = vunpack.i.h.bf16 %v4914_v13 }
 0x309   :  { %4356 = vmatprep.subr.bf16.mxu0 %v5461_v37  ;;  %4512 = vmatprep.subr.bf16.mxu1 %v4511_v17  ;;  %v3456_v21 = vunpack.c.l.bf16 %v5709_v33 }
 0x30a   :  { %v5701_v56 = vpop.permute.xlu0 %4928  ;;  %3872 = vmatprep.mubr.f32.mxu0 %v3420_v15  ;;  %v5728_v35 = vpop.permute.xlu1 %4923 }
 0x30b   :  { %4060 = vmatmul.mubr.f32.vlgmr.msra.gmra.mrb[16].mxu1 %v3449_v28  ;;  %3873 = vmatmul.mubr.f32.gmra.mrb[18].mxu0 %v3421_v58  ;;  %v4915_v28 = vunpack.i.l.bf16 %v4914_v13  ;;  %v4921_v58 = vunpack.i.h.bf16 %v5686_v57  ;;  %v4926_v26 = vunpack.i.h.bf16 %v5728_v35 }
 0x30c   :  { %4358 = vmatpush3.bf16.msra.mxu0 %v5461_v37  ;;  %4514 = vmatpush3.bf16.msra.mxu1 %v4511_v17 }
 0x30d   :  { %4360 = vmatprep.subr.bf16.mxu0 %v5467_v43  ;;  %4516 = vmatprep.subr.bf16.mxu1 %v4515_v22  ;;  %v4551_v57 = vpack.c.bf16 %v4921_v58, %v4920_v16 }
 0x30e   :  { %v5713_v0 = vpop.permute.xlu0 %4938  ;;  %3907 = vmatprep.mubr.f32.mxu0 %v3408_v19  ;;  %4062 = vmatprep.mubr.f32.mxu1 %v3452_v61  ;;  %v4547_v19 = vpack.c.bf16 %v4916_v49, %v4915_v28 }
 0x30f   :  { %4063 = vmatmul.mubr.f32.gmra.mrb[18].mxu1 %v3453_v63  ;;  %v4941_v32 = vunpack.i.h.bf16 %v5713_v0 }
 0x310   :  { %4362 = vmatpush3.bf16.msra.mxu0 %v5467_v43  ;;  %4518 = vmatpush3.bf16.msra.mxu1 %v4515_v22  ;;  %v4527_v43 = vpack.c.bf16 %v4876_v5, %v4875_v6  ;;  %v4930_v5 = vunpack.i.l.bf16 %v5701_v56 }
 0x311   :  { %4364 = vmatprep.subr.bf16.mxu0 %v5473_v47  ;;  %4520 = vmatprep.subr.bf16.mxu1 %v4519_v1 }
 0x312   :  { %v4944_v37 = vpop.permute.xlu0 %4943  ;;  %4097 = vmatprep.mubr.f32.mxu1 %v3456_v21  ;;  %v3464_v21 = vunpack.c.l.bf16 %v5756_v62 }
 0x313   :  { %v4946_v34 = vunpack.i.h.bf16 %v4944_v37 }
 0x314   :  { %4366 = vmatpush3.bf16.msra.mxu0 %v5473_v47  ;;  %4522 = vmatpush3.bf16.msra.mxu1 %v4519_v1  ;;  %v4535_v47 = vpack.c.bf16 %v4896_v12, %v4895_v4  ;;  %v4925_v1 = vunpack.i.l.bf16 %v5728_v35 }
 0x315   :  { %4368 = vmatprep.subr.bf16.mxu0 %v5479_v51  ;;  %4524 = vmatprep.subr.bf16.mxu1 %v4523_v23 }
 0x316   :  { %v4959_v9 = vpop.permute.xlu0 %4958 }
 0x317   :  { %v4961_v44 = vunpack.i.h.bf16 %v4959_v9  ;;  %v4960_v45 = vunpack.i.l.bf16 %v4959_v9  ;;  %v4555_v9 = vpack.c.bf16 %v4926_v26, %v4925_v1 }
 0x318   :  { %4370 = vmatpush3.bf16.msra.mxu0 %v5479_v51  ;;  %4526 = vmatpush3.bf16.msra.mxu1 %v4523_v23  ;;  %v4945_v51 = vunpack.i.l.bf16 %v4944_v37  ;;  %v4931_v23 = vunpack.i.h.bf16 %v5701_v56 }
 0x319   :  { %4372 = vmatprep.subr.bf16.mxu0 %v5485_v55  ;;  %4528 = vmatprep.subr.bf16.mxu1 %v4527_v43  ;;  %v4387_v15 = vpack.c.bf16 %v4961_v44, %v4960_v45 }
 0x31a   :  { %v4969_v27 = vpop.permute.xlu0 %4968  ;;  %v4383_v42 = vpack.c.bf16 %v4946_v34, %v4945_v51  ;;  %v4559_v12 = vpack.c.bf16 %v4931_v23, %v4930_v5  ;;  %v4940_v34 = vunpack.i.l.bf16 %v5713_v0  ;;  %v3486_v0 = vld [vmem:[%s5957_s4 + $0x28] sm:$0xff]  }
 0x31b   :  { %v4970_v17 = vunpack.i.l.bf16 %v4969_v27 }
 0x31c   :  { %4374 = vmatpush3.bf16.msra.mxu0 %v5485_v55  ;;  %4530 = vmatpush3.bf16.msra.mxu1 %v4527_v43  ;;  %v4911_v55 = vunpack.i.h.bf16 %v5677_v48  ;;  %v5740_v48 = vpop.permute.xlu1 %4933 }
 0x31d   :  { %4376 = vmatprep.subr.bf16.mxu0 %v5491_v14  ;;  %4532 = vmatprep.subr.bf16.mxu1 %v4531_v30  ;;  %v4936_v4 = vunpack.i.h.bf16 %v5740_v48  ;;  %v4935_v13 = vunpack.i.l.bf16 %v5740_v48  ;;  %v3428_v48 = vunpack.c.l.bf16 %v3486_v0 }
 0x31e   :  { %v4979_v24 = vpop.permute.xlu0 %4978  ;;  %v4543_v46 = vpack.c.bf16 %v4911_v55, %v4910_v36 }
 0x31f   :  { %v4981_v22 = vunpack.i.h.bf16 %v4979_v24  ;;  %v4980_v25 = vunpack.i.l.bf16 %v4979_v24  ;;  %v4563_v51 = vpack.c.bf16 %v4936_v4, %v4935_v13  ;;  %v1967_v4 = vld [vmem:[%s5959_s6] sm:$0xf] }
 0x320   :  { %4378 = vmatpush3.bf16.msra.mxu0 %v5491_v14  ;;  %4534 = vmatpush3.bf16.msra.mxu1 %v4531_v30  ;;  %v3457_v14 = vunpack.c.h.bf16 %v5709_v33  ;;  %v5758_v63 = vpop.permute.xlu1 %4948 }
 0x321   :  { %4380 = vmatprep.subr.bf16.mxu0 %v5505_v20  ;;  %4536 = vmatprep.subr.bf16.mxu1 %v4535_v47  ;;  %v4395_v2 = vpack.c.bf16 %v4981_v22, %v4980_v25 }
 0x322   :  { %v4989_v50 = vpop.permute.xlu0 %4988 }
 0x323   :  { %v4991_v3 = vunpack.i.h.bf16 %v4989_v50  ;;  %v4990_v37 = vunpack.i.l.bf16 %v4989_v50  ;;  %v3496_v50 = vld [vmem:[%s5957_s4 + $0x78] sm:$0xff]  }
 0x324   :  { %4382 = vmatpush3.bf16.msra.mxu0 %v5505_v20  ;;  %4538 = vmatpush3.bf16.msra.mxu1 %v4535_v47  ;;  %v4971_v20 = vunpack.i.h.bf16 %v4969_v27  ;;  %v4954_v6 = vpop.permute.xlu1 %4953 }
 0x325   :  { %4384 = vmatprep.subr.bf16.mxu0 %v4383_v42  ;;  %4540 = vmatprep.subr.bf16.mxu1 %v4539_v41  ;;  %v4399_v43 = vpack.c.bf16 %v4991_v3, %v4990_v37  ;;  %v4956_v8 = vunpack.i.h.bf16 %v4954_v6 }
 0x326   :  { %v4391_v61 = vpack.c.bf16 %v4971_v20, %v4970_v17  ;;  %v4999_v33 = vpop.permute.xlu0 %4998  ;;  %v3465_v20 = vunpack.c.h.bf16 %v5756_v62  ;;  %v3468_v17 = vunpack.c.l.bf16 %v3496_v50 }
 0x327   :  { %3908 = vmatmul.mubr.f32.vlgmr.msra.gmra.mrb[16].mxu0 %v3409_v39  ;;  %v5001_v10 = vunpack.i.h.bf16 %v4999_v33  ;;  %v5000_v11 = vunpack.i.l.bf16 %v4999_v33  ;;  %v4567_v39 = vpack.c.bf16 %v4941_v32, %v4940_v34 }
 0x328   :  { %4386 = vmatpush3.bf16.msra.mxu0 %v4383_v42  ;;  %4542 = vmatpush3.bf16.msra.mxu1 %v4539_v41  ;;  %v4964_v56 = vpop.permute.xlu1 %4963  ;;  %v4951_v41 = vunpack.i.h.bf16 %v5758_v63  ;;  %v4950_v42 = vunpack.i.l.bf16 %v5758_v63 }
 0x329   :  { %4388 = vmatprep.subr.bf16.mxu0 %v4387_v15  ;;  %4544 = vmatprep.subr.bf16.mxu1 %v4543_v46  ;;  %v4403_v27 = vpack.c.bf16 %v5001_v10, %v5000_v11  ;;  %v4966_v28 = vunpack.i.h.bf16 %v4964_v56 }
 0x32a   :  { %3910 = vmatprep.mubr.f32.mxu0 %v3412_v52  ;;  %v5009_v7 = vpop.permute.xlu0 %5008  ;;  %v4571_v45 = vpack.c.bf16 %v4951_v41, %v4950_v42  ;;  %v3429_v52 = vunpack.c.h.bf16 %v3486_v0 }
 0x32b   :  { %4098 = vmatmul.mubr.f32.vlgmr.msra.gmra.mrb[16].mxu1 %v3457_v14  ;;  %3911 = vmatmul.mubr.f32.gmra.mrb[18].mxu0 %v3413_v53  ;;  %v5011_v30 = vunpack.i.h.bf16 %v5009_v7  ;;  %v5010_v47 = vunpack.i.l.bf16 %v5009_v7  ;;  %v4955_v14 = vunpack.i.l.bf16 %v4954_v6 }
 0x32c   :  { %4390 = vmatpush3.bf16.msra.mxu0 %v4387_v15  ;;  %4546 = vmatpush3.bf16.msra.mxu1 %v4543_v46  ;;  %v4974_v36 = vpop.permute.xlu1 %4973  ;;  %v3425_v46 = vunpack.c.h.bf16 %v5745_v29  ;;  %v4965_v15 = vunpack.i.l.bf16 %v4964_v56  ;;  %v3497_v29 = vld [vmem:[%s5957_s4 + $0x80] sm:$0xff]  }
 0x32d   :  { %4392 = vmatprep.subr.bf16.mxu0 %v4391_v61  ;;  %4548 = vmatprep.subr.bf16.mxu1 %v4547_v19  ;;  %v4407_v35 = vpack.c.bf16 %v5011_v30, %v5010_v47  ;;  %v4575_v53 = vpack.c.bf16 %v4956_v8, %v4955_v14  ;;  %v4976_v58 = vunpack.i.h.bf16 %v4974_v36  ;;  %v4975_v16 = vunpack.i.l.bf16 %v4974_v36 }
 0x32e   :  { %3945 = vmatprep.mubr.f32.mxu0 %v3424_v18  ;;  %4100 = vmatprep.mubr.f32.mxu1 %v3460_v59  ;;  %v5019_v31 = vpop.permute.xlu0 %5018  ;;  %v4579_v18 = vpack.c.bf16 %v4966_v28, %v4965_v15  ;;  %v3469_v59 = vunpack.c.h.bf16 %v3496_v50  ;;  %v3473_v10 = vunpack.c.h.bf16 %v3497_v29 }
 0x32f   :  { %4101 = vmatmul.mubr.f32.gmra.mrb[18].mxu1 %v3461_v60  ;;  %v5021_v24 = vunpack.i.h.bf16 %v5019_v31  ;;  %v5020_v55 = vunpack.i.l.bf16 %v5019_v31  ;;  %v3472_v60 = vunpack.c.l.bf16 %v3497_v29 }
 0x330   :  { %4394 = vmatpush3.bf16.msra.mxu0 %v4391_v61  ;;  %4550 = vmatpush3.bf16.msra.mxu1 %v4547_v19  ;;  %v4984_v49 = vpop.permute.xlu1 %4983  ;;  %v4583_v19 = vpack.c.bf16 %v4976_v58, %v4975_v16 }
 0x331   :  { %4396 = vmatprep.subr.bf16.mxu0 %v4395_v2  ;;  %4552 = vmatprep.subr.bf16.mxu1 %v4551_v57  ;;  %v4411_v44 = vpack.c.bf16 %v5021_v24, %v5020_v55  ;;  %v4986_v61 = vunpack.i.h.bf16 %v4984_v49  ;;  %v4985_v22 = vunpack.i.l.bf16 %v4984_v49 }
 0x332   :  { %4135 = vmatprep.mubr.f32.mxu1 %v3464_v21 }
 0x333   :  { %v4587_v62 = vpack.c.bf16 %v4986_v61, %v4985_v22 }
 0x334   :  { %4398 = vmatpush3.bf16.msra.mxu0 %v4395_v2  ;;  %4554 = vmatpush3.bf16.msra.mxu1 %v4551_v57  ;;  %v4994_v54 = vpop.permute.xlu1 %4993 }
 0x335   :  { %4400 = vmatprep.subr.bf16.mxu0 %v4399_v43  ;;  %4556 = vmatprep.subr.bf16.mxu1 %v4555_v9  ;;  %v4996_v63 = vunpack.i.h.bf16 %v4994_v54  ;;  %v4995_v33 = vunpack.i.l.bf16 %v4994_v54 }
 0x337   :  { %v4591_v26 = vpack.c.bf16 %v4996_v63, %v4995_v33 }
 0x338   :  { %4402 = vmatpush3.bf16.msra.mxu0 %v4399_v43  ;;  %4558 = vmatpush3.bf16.msra.mxu1 %v4555_v9  ;;  %v5004_v25 = vpop.permute.xlu1 %5003  ;;  %v3498_v43 = vld [vmem:[%s5957_s4 + $0x88] sm:$0xff]  }
 0x339   :  { %4404 = vmatprep.subr.bf16.mxu0 %v4403_v27  ;;  %4560 = vmatprep.subr.bf16.mxu1 %v4559_v12  ;;  %v5006_v21 = vunpack.i.h.bf16 %v5004_v25  ;;  %v5005_v1 = vunpack.i.l.bf16 %v5004_v25  ;;  %v3476_v11 = vunpack.c.l.bf16 %v3498_v43 }
 0x33b   :  { %v4595_v2 = vpack.c.bf16 %v5006_v21, %v5005_v1 }
 0x33c   :  { %4406 = vmatpush3.bf16.msra.mxu0 %v4403_v27  ;;  %4562 = vmatpush3.bf16.msra.mxu1 %v4559_v12  ;;  %v5014_v57 = vpop.permute.xlu1 %5013  ;;  %v3477_v12 = vunpack.c.h.bf16 %v3498_v43 }
 0x33d   :  { %4408 = vmatprep.subr.bf16.mxu0 %v4407_v35  ;;  %4564 = vmatprep.subr.bf16.mxu1 %v4563_v51  ;;  %v5016_v3 = vunpack.i.h.bf16 %v5014_v57  ;;  %v5015_v37 = vunpack.i.l.bf16 %v5014_v57 }
 0x33f   :  { %v4599_v5 = vpack.c.bf16 %v5016_v3, %v5015_v37 }
 0x340   :  { %4410 = vmatpush3.bf16.msra.mxu0 %v4407_v35  ;;  %4566 = vmatpush3.bf16.msra.mxu1 %v4563_v51  ;;  %v5024_v23 = vpop.permute.xlu1 %5023 }
 0x341   :  { %4412 = vmatprep.subr.bf16.mxu0 %v4411_v44  ;;  %4568 = vmatprep.subr.bf16.mxu1 %v4567_v39  ;;  %v5026_v6 = vunpack.i.h.bf16 %v5024_v23  ;;  %v5025_v7 = vunpack.i.l.bf16 %v5024_v23 }
 0x343   :  { %v4603_v9 = vpack.c.bf16 %v5026_v6, %v5025_v7 }
 0x344   :  { %4414 = vmatpush3.bf16.msra.mxu0 %v4411_v44  ;;  %4570 = vmatpush3.bf16.msra.mxu1 %v4567_v39 }
 0x345   :  { %4572 = vmatprep.subr.bf16.mxu1 %v4571_v45  ;;  %4179 = vmatprep.subr.msk.mxu0 %vm117_vm1, %v1967_v4 }
 0x347   :  { %3946 = vmatmul.mubr.f32.vlgmr.msra.gmra.mrb[16].mxu0 %v3425_v46 }
 0x348   :  { %4574 = vmatpush3.bf16.msra.mxu1 %v4571_v45  ;;  %3948 = vmatprep.mubr.f32.mxu0 %v3428_v48 }
 0x349   :  { %4576 = vmatprep.subr.bf16.mxu1 %v4575_v53  ;;  %4180 = vmatpush3.msk.msra.mxu0 %vm117_vm1, %v1967_v4 }
 0x34b   :  { %3949 = vmatmul.mubr.f32.gmra.mrb[18].mxu0 %v3429_v52  ;;  %4136 = vmatmul.mubr.f32.vlgmr.msra.gmra.mrb[16].mxu1 %v3465_v20 }
 0x34c   :  { %4578 = vmatpush3.bf16.msra.mxu1 %v4575_v53  ;;  %4138 = vmatprep.mubr.f32.mxu1 %v3468_v17 }
 0x34d   :  { %4580 = vmatprep.subr.bf16.mxu1 %v4579_v18 }
 0x34f   :  { %4139 = vmatmul.mubr.f32.gmra.mrb[18].mxu1 %v3469_v59 }
 0x350   :  { %4582 = vmatpush3.bf16.msra.mxu1 %v4579_v18  ;;  %4173 = vmatprep.mubr.f32.mxu1 %v3472_v60 }
 0x351   :  { %4584 = vmatprep.subr.bf16.mxu1 %v4583_v19 }
 0x354   :  { %4586 = vmatpush3.bf16.msra.mxu1 %v4583_v19 }
 0x355   :  { %4588 = vmatprep.subr.bf16.mxu1 %v4587_v62 }
 0x358   :  { %4590 = vmatpush3.bf16.msra.mxu1 %v4587_v62 }
 0x359   :  { %4592 = vmatprep.subr.bf16.mxu1 %v4591_v26 }
 0x35c   :  { %4594 = vmatpush3.bf16.msra.mxu1 %v4591_v26 }
 0x35d   :  { %4596 = vmatprep.subr.bf16.mxu1 %v4595_v2 }
 0x360   :  { %4598 = vmatpush3.bf16.msra.mxu1 %v4595_v2  ;;  %v1942_v2 = vld [vmem:[%s5958_s5] sm:$0x1] }
 0x361   :  { %4600 = vmatprep.subr.bf16.mxu1 %v4599_v5 }
 0x364   :  { %4602 = vmatpush3.bf16.msra.mxu1 %v4599_v5  ;;  %v3372_v5 = vld [vmem:[%s5958_s5 + $0x1] ss:$0 sm:$0xff] }
 0x365   :  { %4604 = vmatprep.subr.bf16.mxu1 %v4603_v9 }
 0x368   :  { %4606 = vmatpush3.bf16.msra.mxu1 %v4603_v9 }
 0x36b   :  { %4174 = vmatmul.mubr.f32.vlgmr.msra.gmra.mrb[16].mxu1 %v3473_v10 }
 0x36c   :  { %4176 = vmatprep.mubr.f32.mxu1 %v3476_v11 }
 0x36f   :  { %4177 = vmatmul.mubr.f32.gmra.mrb[18].mxu1 %v3477_v12 }
 0x41a   :  { %v3947_v13 = vpop.f32.mrb[16].mxu0 }
 0x41b   :  { %v1007_v27 = vpop.f32.mrb[17].mxu0 }
 0x41e   :  { %v3950_v30 = vpop.f32.mrb[18].mxu0 }
 0x41f   :  { %v1017_v47 = vpop.f32.mrb[19].mxu0 }
 0x43e   :  { %v4175_v56 = vpop.f32.mrb[16].mxu1 }
 0x43f   :  { %v4661_v31 = vadd.f32 %v4175_v56, %v3947_v13  ;;  %v1883_v32 = vpop.f32.mrb[17].mxu1 }
 0x440   :  { %v4662_v34 = vadd.f32 %v1883_v32, %v1007_v27 }
 0x441   :  { %v1907_v51 = vsel %vm266_vm2, %v4661_v31, 0.0 }
 0x442   :  { %v1906_v35 = vsel %vm266_vm2, %v4662_v34, 0.0  ;;  %v4178_v24 = vpop.f32.mrb[18].mxu1 }
 0x443   :  { %v1908_v55 = vadd.f32 %v1907_v51, %v1906_v35  ;;  %v4663_v36 = vadd.f32 %v4178_v24, %v3950_v30  ;;  %v1893_v39 = vpop.f32.mrb[19].mxu1 }
 0x444   :  { %v4664_v41 = vadd.f32 %v1893_v39, %v1017_v47  ;;  %v5147_v47 = vmov 0.0  }
 0x445   :  { %v1911_v0 = vsel %vm266_vm2, %v4663_v36, 0.0  ;;  %4195 = vmatprep.mubr.msk.f32.mxu1 %vm5146_vm3, %v5147_v47 }
 0x446   :  { %v1909_v42 = vsel %vm266_vm2, %v4664_v41, 0.0 }
 0x447   :  { %v1910_v44 = vadd.f32 %v1909_v42, %v1908_v55 }
 0x449   :  { %v1912_v45 = vadd.f32 %v1911_v0, %v1910_v44 }
 0x44b   :  { %v1913_v8 = vrot.slane %v1912_v45, 4 }
 0x44d   :  { %v1914_v14 = vadd.f32 %v1913_v8, %v1912_v45 }
 0x44f   :  { %v1915_v46 = vrot.slane %v1914_v14, 2 }
 0x451   :  { %v1916_v49 = vadd.f32 %v1915_v46, %v1914_v14 }
 0x453   :  { %v1917_v48 = vrot.slane %v1916_v49, 1 }
 0x455   :  { %v1918_v50 = vadd.f32 %v1917_v48, %v1916_v49  ;;  %v3381_v49 = vld [vmem:[%s5960_s7 + $0x8] sm:$0xff]  }
 0x457   :  { %v1919_v52 = vmul.f32 0.03125, %v1918_v50 }
 0x459   :  { %v1920_v53 = vsub.f32 %v4662_v34, %v1919_v52  ;;  %v1921_v28 = vsub.f32 %v4661_v31, %v1919_v52  ;;  %v1922_v15 = vsub.f32 %v4664_v41, %v1919_v52  ;;  %v1923_v20 = vsub.f32 %v4663_v36, %v1919_v52  ;;  %v5821_v36 = vld [vmem:[%s5960_s7] sm:$0xff]  }
 0x45a   :  { %v3480_v39 = vunpack.c.l.bf16 %v5821_v36 }
 0x45b   :  { %v1924_v17 = vmul.f32 %v1920_v53, %v1920_v53  ;;  %v1925_v29 = vmul.f32 %v1921_v28, %v1921_v28  ;;  %v1926_v54 = vmul.f32 %v1922_v15, %v1922_v15  ;;  %v1927_v18 = vmul.f32 %v1923_v20, %v1923_v20 }
 0x45d   :  { %v1928_v58 = vsel %vm266_vm2, %v1924_v17, 0.0  ;;  %v1929_v16 = vsel %vm266_vm2, %v1925_v29, 0.0  ;;  %v1931_v60 = vsel %vm266_vm2, %v1926_v54, 0.0  ;;  %v1933_v61 = vsel %vm266_vm2, %v1927_v18, 0.0 }
 0x45e   :  { %v1930_v59 = vadd.f32 %v1929_v16, %v1928_v58 }
 0x460   :  { %v1932_v19 = vadd.f32 %v1931_v60, %v1930_v59  ;;  %v2327_v60 = vunpack.c.h.bf16 %v3381_v49 }
 0x462   :  { %v1934_v22 = vadd.f32 %v1933_v61, %v1932_v19 }
 0x464   :  { %v1935_v25 = vrot.slane %v1934_v22, 4 }
 0x466   :  { %v1936_v62 = vadd.f32 %v1935_v25, %v1934_v22 }
 0x468   :  { %v1937_v63 = vrot.slane %v1936_v62, 2 }
 0x46a   :  { %v1938_v33 = vadd.f32 %v1937_v63, %v1936_v62 }
 0x46c   :  { %v1939_v57 = vrot.slane %v1938_v33, 1 }
 0x46e   :  { %v1940_v26 = vadd.f32 %v1939_v57, %v1938_v33  ;;  %v3385_v57 = vld [vmem:[%s5960_s7 + $0x10] sm:$0xff]  }
 0x470   :  { %v1941_v21 = vmul.f32 0.03125, %v1940_v26 }
 0x472   :  { %v1943_v1 = vadd.f32 1e-05, %v1941_v21 }
 0x474   :  { %5109 = vrsqrt.f32 %v1943_v1 }
 0x47e   :  { %v5110_v3 = vpop.eup %5109 }
 0x47f   :  { %v1945_v37 = vmul.f32 %v5110_v3, %v1942_v2 }
 0x481   :  { %v1949_v23 = vrot.slane %v1945_v37, %v381_v40  ;;  %v5145_v40 = vmov 0.0|0.0  }
 0x482   :  { %4613 = vmatprep.subr.bf16.mxu0 %v5145_v40  ;;  %4607 = vmatprep.subr.bf16.mxu1 %v5145_v40 }
 0x483   :  { %v1951_v6 = vmul.f32 %v1949_v23, %v1921_v28  ;;  %v1952_v7 = vmul.f32 %v1949_v23, %v1922_v15  ;;  %v1950_v9 = vmul.f32 %v1949_v23, %v1920_v53  ;;  %v1953_v43 = vmul.f32 %v1949_v23, %v1923_v20 }
 0x484   :  { %v2238_v28 = vunpack.c.l.bf16 %v3381_v49  ;;  %v2416_v23 = vunpack.c.l.bf16 %v3385_v57 }
 0x485   :  { %v1960_v10 = vadd.f32 %v3372_v5, %v1951_v6  ;;  %v1961_v11 = vadd.f32 %v3372_v5, %v1952_v7  ;;  %v1959_v12 = vadd.f32 %v3372_v5, %v1950_v9  ;;  %v1962_v27 = vadd.f32 %v3372_v5, %v1953_v43 }
 0x487   :  { %v1964_v4 = vmax.f32 %v1960_v10, 0.0  ;;  %v1963_v13 = vmax.f32 %v1959_v12, 0.0  ;;  %v1965_v30 = vmax.f32 %v1961_v11, 0.0  ;;  %v1966_v38 = vmax.f32 %v1962_v27, 0.0 }
 0x488   :  { %v3481_v11 = vunpack.c.h.bf16 %v5821_v36 }
 0x489   :  { %4181 = vmatprep.mubr.msk.f32.mxu0 %vm266_vm2, %v1963_v13 }
 0x48a   :  { %4182 = vmatmul.mubr.msk.f32.vlgmr.msra.gmra.mrb[20].mxu0 %vm266_vm2, %v1964_v4 }
 0x48b   :  { %4184 = vmatprep.mubr.msk.f32.mxu0 %vm266_vm2, %v1965_v30  ;;  %v2505_v30 = vunpack.c.h.bf16 %v3385_v57 }
 0x48e   :  { %4185 = vmatmul.mubr.msk.f32.gmra.mrb[22].mxu0 %vm266_vm2, %v1966_v38 }
 0x48f   :  { %4206 = vmatprep.mubr.msk.f32.mxu0 %vm5146_vm3, %v5147_v47 }
 0x55d   :  { %v4183_v56 = vpop.f32.mrb[20].mxu0 }
 0x55e   :  { %v2049_v31 = vpop.f32.mrb[21].mxu0 }
 0x55f   :  { %v5027_v32 = vpack.i.bf16 %v4183_v56, %v2049_v31  ;;  %v4614_v34 = vpack.c.bf16 %v4183_v56, %v2049_v31 }
 0x561   :  { %5028 = vrot.lane.b32.xlu0 %v5027_v32, %s5143_s17  ;;  %v4186_v51 = vpop.f32.mrb[22].mxu0  ;;  %4615 = vmatpush3.bf16.msra.mxu0 %v4614_v34  ;;  %v3389_v34 = vld [vmem:[%s5960_s7 + $0x18] sm:$0xff]  }
 0x562   :  { %v2059_v35 = vpop.f32.mrb[23].mxu0  ;;  %4616 = vmatprep.subr.bf16.mxu0 %v5145_v40  ;;  %v2594_v36 = vunpack.c.l.bf16 %v3389_v34 }
 0x563   :  { %v5032_v24 = vpack.i.bf16 %v4186_v51, %v2059_v35  ;;  %v4617_v55 = vpack.c.bf16 %v4186_v51, %v2059_v35 }
 0x565   :  { %5038 = vrot.lane.b32.xlu0 %v5027_v32, %s5137_s2  ;;  %5033 = vrot.lane.b32.xlu1 %v5032_v24, %s5143_s17 }
 0x566   :  { %4618 = vmatpush3.bf16.msra.mxu0 %v4617_v55 }
 0x567   :  { %4619 = vmatprep.subr.bf16.mxu0 %v5145_v40 }
 0x569   :  { %5048 = vrot.lane.b32.xlu0 %v5027_v32, %s5138_s27  ;;  %5043 = vrot.lane.b32.xlu1 %v5032_v24, %s5137_s2 }
 0x56a   :  { %4207 = vmatmul.mubr.msk.f32.vlgmr.msra.gmra.mrb[24].mxu0 %vm2089_vm4, %v3480_v39 }
 0x56b   :  { %4217 = vmatprep.mubr.msk.f32.mxu0 %vm5146_vm3, %v5147_v47 }
 0x56d   :  { %5058 = vrot.lane.b32.xlu0 %v5027_v32, %s5139_s28  ;;  %5053 = vrot.lane.b32.xlu1 %v5032_v24, %s5138_s27 }
 0x571   :  { %5068 = vrot.lane.b32.xlu0 %v5027_v32, %s5141_s29  ;;  %5063 = vrot.lane.b32.xlu1 %v5032_v24, %s5139_s28  ;;  %s5150_s28 = smov [#allocation2]  }
 0x575   :  { %5078 = vrot.lane.b32.xlu0 %v5032_v24, %s5141_s29  ;;  %5073 = vrot.lane.b32.xlu1 %v5027_v32, %s5140_s1 }
 0x579   :  { %5088 = vrot.lane.b32.xlu0 %v5027_v32, %s5142_s16  ;;  %5083 = vrot.lane.b32.xlu1 %v5032_v24, %s5140_s1  ;;  %s3293_s1 = sshll.u32 %s5150_s28, 4  ;;  %s3294_s1 = int_to_ptr.vmem [resolvable:$true] %s3293_s1 }
 0x57a   :  { %p5118_p1 = scmp.lt.s32.totalorder %s3294_s1, %s3294_s1 }
 0x57d   :  { %5098 = vrot.lane.b32.xlu0 %v5027_v32, %s5144_s18  ;;  %5093 = vrot.lane.b32.xlu1 %v5032_v24, %s5142_s16 }
 0x581   :  { %5103 = vrot.lane.b32.xlu1 %v5032_v24, %s5144_s18 }
 0x5d3   :  { %v5029_v41 = vpop.permute.xlu0 %5028 }
 0x5d4   :  { %v5031_v42 = vunpack.i.h.bf16 %v5029_v41  ;;  %v5030_v44 = vunpack.i.l.bf16 %v5029_v41 }
 0x5d6   :  { %v4620_v0 = vpack.c.bf16 %v5031_v42, %v5030_v44 }
 0x5d7   :  { %v5039_v45 = vpop.permute.xlu0 %5038  ;;  %v5034_v8 = vpop.permute.xlu1 %5033 }
 0x5d8   :  { %v5036_v14 = vunpack.i.h.bf16 %v5034_v8  ;;  %v5035_v46 = vunpack.i.l.bf16 %v5034_v8  ;;  %4621 = vmatpush3.bf16.msra.mxu0 %v4620_v0  ;;  %v5041_v48 = vunpack.i.h.bf16 %v5039_v45  ;;  %v5040_v50 = vunpack.i.l.bf16 %v5039_v45 }
 0x5d9   :  { %4622 = vmatprep.subr.bf16.mxu0 %v5145_v40 }
 0x5da   :  { %v4623_v52 = vpack.c.bf16 %v5036_v14, %v5035_v46  ;;  %v4626_v15 = vpack.c.bf16 %v5041_v48, %v5040_v50  ;;  %v2683_v46 = vunpack.c.h.bf16 %v3389_v34 }
 0x5db   :  { %v5044_v53 = vpop.permute.xlu1 %5043  ;;  %v5049_v29 = vpop.permute.xlu0 %5048 }
 0x5dc   :  { %4624 = vmatpush3.bf16.msra.mxu0 %v4623_v52  ;;  %v5046_v20 = vunpack.i.h.bf16 %v5044_v53  ;;  %v5045_v17 = vunpack.i.l.bf16 %v5044_v53  ;;  %v5051_v18 = vunpack.i.h.bf16 %v5049_v29  ;;  %v5050_v58 = vunpack.i.l.bf16 %v5049_v29  ;;  %v3393_v52 = vld [vmem:[%s5960_s7 + $0x20] sm:$0xf] }
 0x5dd   :  { %4625 = vmatprep.subr.bf16.mxu0 %v5145_v40 }
 0x5de   :  { %v4629_v16 = vpack.c.bf16 %v5046_v20, %v5045_v17  ;;  %v4632_v61 = vpack.c.bf16 %v5051_v18, %v5050_v58  ;;  %v2868_v17 = vld [vmem:[%s5962_s9] sm:$0xf] }
 0x5df   :  { %v5054_v54 = vpop.permute.xlu1 %5053  ;;  %4218 = vmatmul.mubr.msk.f32.vlgmr.msra.gmra.mrb[26].mxu0 %vm2089_vm4, %v2238_v28  ;;  %v5059_v19 = vpop.permute.xlu0 %5058  ;;  %v2772_v28 = vunpack.c.l.bf16 %v3393_v52 }
 0x5e0   :  { %4627 = vmatpush3.bf16.msra.mxu0 %v4626_v15  ;;  %4228 = vmatprep.mubr.msk.f32.mxu0 %vm5146_vm3, %v5147_v47  ;;  %v5056_v22 = vunpack.i.h.bf16 %v5054_v54  ;;  %v5055_v25 = vunpack.i.l.bf16 %v5054_v54  ;;  %v5061_v26 = vunpack.i.h.bf16 %v5059_v19  ;;  %v5060_v21 = vunpack.i.l.bf16 %v5059_v19 }
 0x5e1   :  { %4628 = vmatprep.subr.bf16.mxu0 %v5145_v40 }
 0x5e2   :  { %v4635_v1 = vpack.c.bf16 %v5056_v22, %v5055_v25  ;;  %v4638_v7 = vpack.c.bf16 %v5061_v26, %v5060_v21 }
 0x5e3   :  { %v5064_v59 = vpop.permute.xlu1 %5063  ;;  %v5069_v3 = vpop.permute.xlu0 %5068 }
 0x5e4   :  { %4630 = vmatpush3.bf16.msra.mxu0 %v4629_v16  ;;  %v5066_v9 = vunpack.i.h.bf16 %v5064_v59  ;;  %v5065_v43 = vunpack.i.l.bf16 %v5064_v59  ;;  %v5071_v4 = vunpack.i.h.bf16 %v5069_v3  ;;  %v5070_v13 = vunpack.i.l.bf16 %v5069_v3 }
 0x5e5   :  { %4631 = vmatprep.subr.bf16.mxu0 %v5145_v40 }
 0x5e6   :  { %v4641_v27 = vpack.c.bf16 %v5066_v9, %v5065_v43  ;;  %v4644_v38 = vpack.c.bf16 %v5071_v4, %v5070_v13  ;;  %v2945_v13 = vld [vmem:[%s5964_s11] sm:$0x1] }
 0x5e7   :  { %v5074_v62 = vpop.permute.xlu1 %5073  ;;  %4229 = vmatmul.mubr.msk.f32.vlgmr.msra.gmra.mrb[28].mxu0 %vm2089_vm4, %v2327_v60  ;;  %v5079_v12 = vpop.permute.xlu0 %5078 }
 0x5e8   :  { %v5076_v63 = vunpack.i.h.bf16 %v5074_v62  ;;  %v5075_v33 = vunpack.i.l.bf16 %v5074_v62  ;;  %4633 = vmatpush3.bf16.msra.mxu0 %v4632_v61  ;;  %4239 = vmatprep.mubr.msk.f32.mxu0 %vm5146_vm3, %v5147_v47  ;;  %v5081_v56 = vunpack.i.h.bf16 %v5079_v12  ;;  %v5080_v31 = vunpack.i.l.bf16 %v5079_v12  ;;  %v3398_v12 = vld [vmem:[%s5964_s11 + $0x1] sm:$0x1] }
 0x5e9   :  { %4634 = vmatprep.subr.bf16.mxu0 %v5145_v40  ;;  %v2949_v4 = vunpack.c.l.bf16 %v3398_v12 }
 0x5ea   :  { %v4608_v2 = vpack.c.bf16 %v5076_v63, %v5075_v33  ;;  %v4647_v51 = vpack.c.bf16 %v5081_v56, %v5080_v31 }
 0x5eb   :  { %v5084_v37 = vpop.permute.xlu1 %5083  ;;  %v5089_v32 = vpop.permute.xlu0 %5088 }
 0x5ec   :  { %v5086_v5 = vunpack.i.h.bf16 %v5084_v37  ;;  %v5085_v6 = vunpack.i.l.bf16 %v5084_v37  ;;  %4609 = vmatpush3.bf16.msra.mxu1 %v4608_v2  ;;  %4636 = vmatpush3.bf16.msra.mxu0 %v4635_v1  ;;  %v5091_v35 = vunpack.i.h.bf16 %v5089_v32  ;;  %v5090_v24 = vunpack.i.l.bf16 %v5089_v32  ;;  %v3403_v32 = vld [vmem:[%s5964_s11 + $0x3] sm:$0x1] }
 0x5ed   :  { %4610 = vmatprep.subr.bf16.mxu1 %v5145_v40  ;;  %4637 = vmatprep.subr.bf16.mxu0 %v5145_v40 }
 0x5ee   :  { %v4611_v10 = vpack.c.bf16 %v5086_v5, %v5085_v6  ;;  %v4650_v39 = vpack.c.bf16 %v5091_v35, %v5090_v24 }
 0x5ef   :  { %4240 = vmatmul.mubr.msk.f32.vlgmr.msra.gmra.mrb[30].mxu0 %vm2089_vm4, %v2416_v23  ;;  %v5094_v55 = vpop.permute.xlu1 %5093  ;;  %v5099_v44 = vpop.permute.xlu0 %5098  ;;  %v3395_v23 = vld [vmem:[%s5961_s8] ss:$0 sm:$0xff]  ;;  %s5148_s8 = smov 80  }
 0x5f0   :  { %4612 = vmatpush3.bf16.msra.mxu1 %v4611_v10  ;;  %4639 = vmatpush3.bf16.msra.mxu0 %v4638_v7  ;;  %v5096_v41 = vunpack.i.h.bf16 %v5094_v55  ;;  %v5095_v42 = vunpack.i.l.bf16 %v5094_v55  ;;  %v5101_v0 = vunpack.i.h.bf16 %v5099_v44  ;;  %v5100_v45 = vunpack.i.l.bf16 %v5099_v44 }
 0x5f1   :  { %4640 = vmatprep.subr.bf16.mxu0 %v5145_v40  ;;  %4250 = vmatprep.mubr.msk.f32.mxu0 %vm5146_vm3, %v5147_v47 }
 0x5f2   :  { %v4653_v8 = vpack.c.bf16 %v5096_v41, %v5095_v42  ;;  %v4656_v49 = vpack.c.bf16 %v5101_v0, %v5100_v45  ;;  %v3405_v45 = vld [vmem:[%s5963_s10] ss:$0 sm:$0xff]  ;;  %s5113_s10 = scalar_lea.vmem %s3294_s1, 32 }
 0x5f3   :  { %4196 = vmatmul.mubr.msk.f32.vlgmr.msra.gmra.mrb[20].mxu1 %vm2089_vm4, %v3481_v11  ;;  %v5104_v14 = vpop.permute.xlu1 %5103  ;;  %v3274_v11 = vld [vmem:[%s5965_s12] sm:$0x3]  ;;  %p5114_p0 = scmp.ne.s32.totalorder %s3294_s1, %s5113_s10  ;;  %p5119_p2 = scmp.lt.s32.totalorder %s5113_s10, %s5113_s10 }
 0x5f4   :  { %4642 = vmatpush3.bf16.msra.mxu0 %v4641_v27  ;;  %v5106_v48 = vunpack.i.h.bf16 %v5104_v14  ;;  %v5105_v50 = vunpack.i.l.bf16 %v5104_v14 }
 0x5f5   :  { %4643 = vmatprep.subr.bf16.mxu0 %v5145_v40  ;;  %p5120_p3 = por %p5119_p2, %p5118_p1 }
 0x5f6   :  { %v4659_v53 = vpack.c.bf16 %v5106_v48, %v5105_v50 }
 0x5f7   :  { %4251 = vmatmul.mubr.msk.f32.vlgmr.msra.gmra.mrb[32].mxu0 %vm2089_vm4, %v2505_v30  ;;  %v2946_v30 = vunpack.c.l.bf16 %v2945_v13  ;;  %p5121_p4 = pnand %p5120_p3, %p5114_p0 }
 0x5f8   :  { %4645 = vmatpush3.bf16.msra.mxu0 %v4644_v38  ;;  %4261 = vmatprep.mubr.msk.f32.mxu0 %vm5146_vm3, %v5147_v47  ;;  %v3401_v38 = vld [vmem:[%s5964_s11 + $0x2] sm:$0x1] }
 0x5f9   :  { %4646 = vmatprep.subr.bf16.mxu0 %v5145_v40  ;;  %v3103_v31 = vunpack.c.l.bf16 %v3401_v38 }
 0x5fc   :  { %4648 = vmatpush3.bf16.msra.mxu0 %v4647_v51  ;;  %v3183_v51 = vunpack.c.l.bf16 %v3403_v32 }
 0x5fd   :  { %4649 = vmatprep.subr.bf16.mxu0 %v5145_v40 }
 0x5ff   :  { %4262 = vmatmul.mubr.msk.f32.vlgmr.msra.gmra.mrb[34].mxu0 %vm2089_vm4, %v2594_v36 }
 0x600   :  { %4651 = vmatpush3.bf16.msra.mxu0 %v4650_v39  ;;  %4272 = vmatprep.mubr.msk.f32.mxu0 %vm5146_vm3, %v5147_v47 }
 0x601   :  { %4652 = vmatprep.subr.bf16.mxu0 %v5145_v40 }
 0x604   :  { %4654 = vmatpush3.bf16.msra.mxu0 %v4653_v8 }
 0x605   :  { %4655 = vmatprep.subr.bf16.mxu0 %v5145_v40 }
 0x607   :  { %4273 = vmatmul.mubr.msk.f32.vlgmr.msra.gmra.mrb[36].mxu0 %vm2089_vm4, %v2683_v46 }
 0x608   :  { %4657 = vmatpush3.bf16.msra.mxu0 %v4656_v49  ;;  %4283 = vmatprep.mubr.msk.f32.mxu0 %vm5146_vm3, %v5147_v47 }
 0x609   :  { %4658 = vmatprep.subr.bf16.mxu0 %v5145_v40 }
 0x60c   :  { %4660 = vmatpush3.bf16.msra.mxu0 %v4659_v53 }
 0x60d   :  { %4286 = vmatprep.subr.mxu0 %v5147_v47 }
 0x60f   :  { %4284 = vmatmul.mubr.msk.f32.vlgmr.msra.gmra.mrb[38].mxu0 %vm2089_vm4, %v2772_v28 }
 0x610   :  { %4288 = vmatprep.mubr.msk.f32.mxu0 %vm5146_vm3, %v5147_v47  ;;  %4287 = vmatpush3.msk.msra.mxu0 %vm117_vm1, %v2868_v17 }
 0x611   :  { %4291 = vmatprep.subr.mxu0 %v5147_v47 }
 0x63d   :  { %v2232_v15 = vpop.f32.mrb[24].mxu0 }
 0x63e   :  { %v4208_v20 = vpop.f32.mrb[25].mxu0 }
 0x6b2   :  { %v2320_v40 = vpop.f32.mrb[26].mxu0 }
 0x6b3   :  { %v4219_v29 = vpop.f32.mrb[27].mxu0 }
 0x6ba   :  { %v2409_v54 = vpop.f32.mrb[28].mxu0 }
 0x6bb   :  { %v4230_v18 = vpop.f32.mrb[29].mxu0 }
 0x6c2   :  { %v2498_v58 = vpop.f32.mrb[30].mxu0 }
 0x6c3   :  { %v4241_v16 = vpop.f32.mrb[31].mxu0 }
 0x6c6   :  { %v2159_v59 = vpop.f32.mrb[20].mxu1 }
 0x6c7   :  { %v2233_v60 = vadd.f32 %v2232_v15, %v2159_v59  ;;  %v4197_v19 = vpop.f32.mrb[21].mxu1 }
 0x6c9   :  { %v2324_v61 = vadd.f32 %v2320_v40, %v2233_v60 }
 0x6ca   :  { %v2587_v22 = vpop.f32.mrb[32].mxu0 }
 0x6cb   :  { %v2413_v25 = vadd.f32 %v2409_v54, %v2324_v61  ;;  %v4252_v62 = vpop.f32.mrb[33].mxu0 }
 0x6cd   :  { %v2502_v63 = vadd.f32 %v2498_v58, %v2413_v25 }
 0x6cf   :  { %v2591_v33 = vadd.f32 %v2587_v22, %v2502_v63 }
 0x6d2   :  { %v2676_v57 = vpop.f32.mrb[34].mxu0 }
 0x6d3   :  { %v2680_v26 = vadd.f32 %v2676_v57, %v2591_v33  ;;  %v4263_v21 = vpop.f32.mrb[35].mxu0 }
 0x6da   :  { %v2765_v1 = vpop.f32.mrb[36].mxu0 }
 0x6db   :  { %v2769_v2 = vadd.f32 %v2765_v1, %v2680_v26  ;;  %v4274_v3 = vpop.f32.mrb[37].mxu0 }
 0x6e2   :  { %v2854_v37 = vpop.f32.mrb[38].mxu0 }
 0x6e3   :  { %v2858_v5 = vadd.f32 %v2854_v37, %v2769_v2  ;;  %v4285_v6 = vpop.f32.mrb[39].mxu0 }
 0x6e5   :  { %v2866_v7 = vadd.f32 %v3395_v23, %v2858_v5 }
 0x6e7   :  { %v2867_v9 = vmax.f32 %v2866_v7, 0.0 }
 0x6e9   :  { %4289 = vmatmul.mubr.msk.f32.vlgmr.msra.gmra.mrb[40].mxu0 %vm266_vm2, %v2867_v9 }
 0x6ea   :  { %4293 = vmatprep.mubr.msk.f32.mxu0 %vm5146_vm3, %v5147_v47 }
 0x7bc   :  { %v2941_v43 = vpop.f32.mrb[40].mxu0 }
 0x7bd   :  { %3104 = vrot.lane.b32.xlu1 %v2941_v43, %s5144_s18  ;;  %2951 = vrot.lane.b32.xlu0 %v2941_v43, %s5138_s27  ;;  %v4290_v10 = vpop.f32.mrb[41].mxu0 }
 0x7c1   :  { %3184 = vrot.lane.b32.xlu0 %v2941_v43, %s5148_s8  ;;  %3276 = vrot.lane.b32.xlu1 %v3274_v11, %s5149_s25 }
 0x82f   :  { %v2952_v27 = vpop.permute.xlu0 %2951  ;;  %v3105_v56 = vpop.permute.xlu1 %3104 }
 0x830   :  { %4292 = vmatpush3.msra.mxu0 %v2952_v27 }
 0x831   :  { %4294 = vmatmul.mubr.msk.f32.vlgmr.msra.gmra.mrb[42].mxu0 %vm2954_vm5, %v2949_v4  ;;  %4296 = vmatprep.subr.mxu0 %v5147_v47 }
 0x832   :  { %4297 = vmatpush3.msra.mxu0 %v2941_v43  ;;  %4298 = vmatprep.mubr.msk.f32.mxu0 %vm5146_vm3, %v5147_v47 }
 0x833   :  { %4301 = vmatprep.subr.mxu0 %v5147_v47  ;;  %v3185_v34 = vpop.permute.xlu0 %3184  ;;  %v3277_v48 = vpop.permute.xlu1 %3276 }
 0x835   :  { %4299 = vmatmul.mubr.msk.f32.vlgmr.msra.gmra.mrb[44].mxu0 %vm2954_vm5, %v2946_v30 }
 0x836   :  { %4302 = vmatpush3.msra.mxu0 %v3105_v56  ;;  %4303 = vmatprep.mubr.msk.f32.mxu0 %vm5146_vm3, %v5147_v47 }
 0x837   :  { %4306 = vmatprep.subr.mxu0 %v5147_v47 }
 0x839   :  { %4304 = vmatmul.mubr.msk.f32.vlgmr.msra.gmra.mrb[46].mxu0 %vm2954_vm5, %v3103_v31 }
 0x83a   :  { %4307 = vmatpush3.msra.mxu0 %v3185_v34  ;;  %4308 = vmatprep.mubr.msk.f32.mxu0 %vm5146_vm3, %v5147_v47 }
 0x83d   :  { %4309 = vmatmul.mubr.msk.f32.vlgmr.msra.gmra.mrb[48].mxu0 %vm2954_vm5, %v3183_v51 }
 0x904   :  { %v3024_v35 = vpop.f32.mrb[42].mxu0 }
 0x905   :  { %v4295_v24 = vpop.f32.mrb[43].mxu0 }
 0x908   :  { %v3097_v55 = vpop.f32.mrb[44].mxu0 }
 0x909   :  { %v3098_v36 = vadd.f32 %v3097_v55, %v3024_v35  ;;  %v4300_v39 = vpop.f32.mrb[45].mxu0 }
 0x90c   :  { %v3176_v41 = vpop.f32.mrb[46].mxu0 }
 0x90d   :  { %v3180_v42 = vadd.f32 %v3176_v41, %v3098_v36  ;;  %v4305_v44 = vpop.f32.mrb[47].mxu0 }
 0x910   :  { %v3256_v0 = vpop.f32.mrb[48].mxu0 }
 0x911   :  { %v3260_v8 = vadd.f32 %v3256_v0, %v3180_v42  ;;  %v4310_v14 = vpop.f32.mrb[49].mxu0 }
 0x913   :  { %v3268_v46 = vadd.f32 %v3405_v45, %v3260_v8 }
 0x915   :  { %3270 = vst.msk [vmem:[%s5967_s14] sm:$0x3] %vm3269_vm6, %v3268_v46  ;;  %v3271_v47 = vmul.f32 0.5, %v3268_v46 }
 0x917   :  { %v3272_v49 = vmul.f32 1.442695, %v3271_v47 }
 0x919   :  { %5111 = vpow2.f32 %v3272_v49 }
 0x923   :  { %v5112_v50 = vpop.eup %5111 }
 0x924   :  { %v3279_v52 = vmul.f32 %v5112_v50, %v3277_v48 }
 0x926   :  { %3281 = vrot.lane.b32.xlu0 %v3279_v52, %s5143_s17 }
 0x998   :  { %v3282_v53 = vpop.permute.xlu0 %3281 }
 0x999   :  { %v3284_v28 = vadd.f32 %v3282_v53, %v3268_v46 }
 0x99b   :  { %3286 = vst.msk [vmem:[#allocation2] sm:$0x3] %vm3285_vm7, %v3284_v28 }
 0x99c   :  { %5124 = shalt.err (!%p5121_p4)
}
 0x99d   :  { %s5125_s16 = scalar_lea.hbm %s5966_s13, 32 }
 0x99e   :  { %p5126_p5 = scmp.ne.s32.totalorder %s5966_s13, %s5125_s16  ;;  %p5129_p6 = scmp.lt.u32.totalorder %s5125_s16, %s5966_s13 }
 0x9a0   :  { %p5131_p7 = pnand %p5129_p6, %p5126_p5 }
 0x9a2   :  { %5134 = shalt.err (!%p5131_p7)
}
 0x9a3   :  { %3296 = dma.vmem_to_hbm [thread:$0]  %s3294_s1, 32, %s5966_s13, [#allocation3]  }
 0x9a4   :  { %5135 = dma.done.wait [#allocation3], 32  }
 0x9a5   :  { %5136 = vsyncadd [#allocation3], 4294967264 }
 0x9a6   :  { %3304 = vsyncpa [#allocation3], 1 }

</bundles_post_ra>
